<compile_context>
chip_gen: v5e
topology: v5e:2x2
jax: 0.10.0
libtpu: 0.0.40
codegen_flags: <defaults>
</compile_context>

<pallas_src>
import functools
import math

import jax
import jax.numpy as jnp
from jax.experimental import pallas as pl
from jax.experimental.pallas import tpu as pltpu


# 48 MiB scoped VMEM: above the 16/32 MiB defaults, below v7x's 64 MiB physical.
_VMEM_LIMIT = 48 * 1024 * 1024
_LN_EPS = 1e-5


def _pick_tile(n, target):
    """Largest divisor of n <= target, preferring 128- then 8-aligned tiles."""
    if n <= target:
        return n
    for align in (128, 8, 1):
        cands = [t for t in range(align, target + 1, align) if n % t == 0]
        if cands:
            return max(cands)
    return n


def _layernorm(y, gamma, beta, eps):
    mu = jnp.mean(y, axis=-1, keepdims=True)
    var = jnp.mean(jnp.square(y - mu), axis=-1, keepdims=True)
    return (y - mu) * jax.lax.rsqrt(var + eps) * gamma + beta


# ----------------------- embedding + positional encoding --------------------


def _embed_pe_kernel(x_ref, w_ref, b_ref, pe_ref, o_ref):
    # (S, F) @ (F, D) + bias + positional encoding, one batch element per step.
    y = jnp.dot(x_ref[0], w_ref[...], preferred_element_type=jnp.float32)
    o_ref[0] = (y + b_ref[...] + pe_ref[0]).astype(o_ref.dtype)


def embed_with_pe(x, w, b, pe):
    B, S, F = x.shape
    D = w.shape[1]
    return pl.pallas_call(
        _embed_pe_kernel,
        grid=(B,),
        out_shape=jax.ShapeDtypeStruct((B, S, D), x.dtype),
        in_specs=[
            pl.BlockSpec((1, S, F), lambda i: (i, 0, 0)),
            pl.BlockSpec((F, D), lambda i: (0, 0)),
            pl.BlockSpec((1, D), lambda i: (0, 0)),
            pl.BlockSpec((1, S, D), lambda i: (0, 0, 0)),
        ],
        out_specs=pl.BlockSpec((1, S, D), lambda i: (i, 0, 0)),
        compiler_params=pltpu.CompilerParams(
            dimension_semantics=("parallel",), vmem_limit_bytes=_VMEM_LIMIT),
    )(x, w, b.reshape(1, D), pe.reshape(1, S, D))


# --------------------- fused attention block (QKV+attn+Wo+LN1) --------------


def _attn_block_kernel(x_ref, wqkv_ref, bqkv_ref, wo_ref, bo_ref, g_ref, beta_ref,
                       o_ref, *, nhead, eps):
    x = x_ref[0].astype(jnp.float32)                 # (S, D), lane-dense
    S, D = x.shape
    dh = D // nhead
    scale = 1.0 / math.sqrt(dh)

    # Fused QKV projection: one (S, D) @ (D, 3D) matmul.
    qkv = jnp.dot(x, wqkv_ref[...], preferred_element_type=jnp.float32) + bqkv_ref[...]
    q = qkv[:, 0 * D:1 * D]
    k = qkv[:, 1 * D:2 * D]
    v = qkv[:, 2 * D:3 * D]

    heads = []
    for h in range(nhead):                           # static unroll over heads
        qh = q[:, h * dh:(h + 1) * dh]
        kh = k[:, h * dh:(h + 1) * dh]
        vh = v[:, h * dh:(h + 1) * dh]
        s = jax.lax.dot_general(qh, kh, (((1,), (1,)), ((), ())),
                                preferred_element_type=jnp.float32) * scale
        s = s - jnp.max(s, axis=-1, keepdims=True)
        p = jnp.exp(s)
        p = p * pl.reciprocal(jnp.sum(p, axis=-1, keepdims=True), approx=True)
        heads.append(jnp.dot(p, vh, preferred_element_type=jnp.float32))
    attn = jnp.concatenate(heads, axis=-1)           # (S, D)

    # Output projection + residual + LayerNorm1 epilogue (post-norm).
    attn = jnp.dot(attn, wo_ref[...], preferred_element_type=jnp.float32) + bo_ref[...]
    y = x + attn
    o_ref[0] = _layernorm(y, g_ref[...], beta_ref[...], eps).astype(o_ref.dtype)


def attention_block(x, wqkv, bqkv, wo, bo, gamma, beta, *, nhead, eps=_LN_EPS):
    B, S, D = x.shape
    kernel = functools.partial(_attn_block_kernel, nhead=nhead, eps=eps)
    return pl.pallas_call(
        kernel,
        grid=(B,),
        out_shape=jax.ShapeDtypeStruct((B, S, D), x.dtype),
        in_specs=[
            pl.BlockSpec((1, S, D), lambda i: (i, 0, 0)),
            pl.BlockSpec((D, 3 * D), lambda i: (0, 0)),
            pl.BlockSpec((1, 3 * D), lambda i: (0, 0)),
            pl.BlockSpec((D, D), lambda i: (0, 0)),
            pl.BlockSpec((1, D), lambda i: (0, 0)),
            pl.BlockSpec((1, D), lambda i: (0, 0)),
            pl.BlockSpec((1, D), lambda i: (0, 0)),
        ],
        out_specs=pl.BlockSpec((1, S, D), lambda i: (i, 0, 0)),
        compiler_params=pltpu.CompilerParams(
            dimension_semantics=("parallel",), vmem_limit_bytes=_VMEM_LIMIT),
    )(x, wqkv, bqkv.reshape(1, 3 * D), wo, bo.reshape(1, D),
      gamma.reshape(1, D), beta.reshape(1, D))


# --------------------- fused FFN block (W1+ReLU+W2+residual+LN2) ------------


def _ffn_block_kernel(h_ref, w1_ref, b1_ref, w2_ref, b2_ref, g_ref, beta_ref,
                      o_ref, acc_ref, *, eps):
    f = pl.program_id(1)

    @pl.when(f == 0)
    def _():
        acc_ref[...] = jnp.zeros_like(acc_ref)

    h = h_ref[...].astype(jnp.float32)               # (tm, D)
    # (tm, tf) intermediate lives only in VMEM/registers: never hits HBM.
    t = jnp.dot(h, w1_ref[...], preferred_element_type=jnp.float32) + b1_ref[...]
    t = jnp.maximum(t, 0.0)                          # ReLU
    acc_ref[...] += jnp.dot(t, w2_ref[...], preferred_element_type=jnp.float32)

    @pl.when(f == pl.num_programs(1) - 1)
    def _():
        y = acc_ref[...] + b2_ref[...] + h           # bias + residual
        o_ref[...] = _layernorm(y, g_ref[...], beta_ref[...], eps).astype(o_ref.dtype)


def ffn_block(h, w1, b1, w2, b2, gamma, beta, *, eps=_LN_EPS,
              tm_target=256, tf_target=512):
    M, D = h.shape
    FF = w1.shape[1]
    tm = _pick_tile(M, tm_target)
    tf = _pick_tile(FF, tf_target)
    kernel = functools.partial(_ffn_block_kernel, eps=eps)
    return pl.pallas_call(
        kernel,
        grid=(M // tm, FF // tf),
        out_shape=jax.ShapeDtypeStruct((M, D), h.dtype),
        in_specs=[
            pl.BlockSpec((tm, D), lambda i, f: (i, 0)),
            pl.BlockSpec((D, tf), lambda i, f: (0, f)),
            pl.BlockSpec((1, tf), lambda i, f: (0, f)),
            pl.BlockSpec((tf, D), lambda i, f: (f, 0)),
            pl.BlockSpec((1, D), lambda i, f: (0, 0)),
            pl.BlockSpec((1, D), lambda i, f: (0, 0)),
            pl.BlockSpec((1, D), lambda i, f: (0, 0)),
        ],
        out_specs=pl.BlockSpec((tm, D), lambda i, f: (i, 0)),
        scratch_shapes=[pltpu.VMEM((tm, D), jnp.float32)],
        compiler_params=pltpu.CompilerParams(
            dimension_semantics=("parallel", "arbitrary"),
            vmem_limit_bytes=_VMEM_LIMIT),
    )(h, w1, b1.reshape(1, FF), w2, b2.reshape(1, D),
      gamma.reshape(1, D), beta.reshape(1, D))


# ------------------------------- decoder linear -----------------------------


def _decoder_kernel(x_ref, w_ref, b_ref, o_ref):
    y = jnp.dot(x_ref[...], w_ref[...], preferred_element_type=jnp.float32)
    o_ref[...] = (y + b_ref[...]).astype(o_ref.dtype)


def decoder_linear(x, w, b, *, tm_target=512):
    # TODO(synk): the (M, 1) output emits masked single-lane stores; for large
    # M fold this projection into the last ffn_block epilogue or emit a
    # lane-dense (M//128, 128) layout and reshape in the wrapper.
    M, D = x.shape
    N = w.shape[1]
    tm = _pick_tile(M, tm_target)
    return pl.pallas_call(
        _decoder_kernel,
        grid=(M // tm,),
        out_shape=jax.ShapeDtypeStruct((M, N), x.dtype),
        in_specs=[
            pl.BlockSpec((tm, D), lambda i: (i, 0)),
            pl.BlockSpec((D, N), lambda i: (0, 0)),
            pl.BlockSpec((1, N), lambda i: (0, 0)),
        ],
        out_specs=pl.BlockSpec((tm, N), lambda i: (i, 0)),
        compiler_params=pltpu.CompilerParams(
            dimension_semantics=("parallel",), vmem_limit_bytes=_VMEM_LIMIT),
    )(x, w, b.reshape(1, N))


# ------------------------------- model glue ---------------------------------


def sinusoidal_pe(seq_len, d_model):
    position = jnp.arange(seq_len, dtype=jnp.float32)[:, None]
    div_term = jnp.exp(
        jnp.arange(0, d_model, 2, dtype=jnp.float32) * (-math.log(10000.0) / d_model))
    pe = jnp.zeros((seq_len, d_model), dtype=jnp.float32)
    pe = pe.at[:, 0::2].set(jnp.sin(position * div_term))
    pe = pe.at[:, 1::2].set(jnp.cos(position * div_term))
    return pe


def init_params(key, input_dim, d_model, nhead, num_layers, dim_ff):
    def dense(k, fan_in, fan_out):
        w = jax.random.normal(k, (fan_in, fan_out), jnp.float32) * 0.05
        b = jnp.zeros((fan_out,), jnp.float32)
        return w, b

    keys = jax.random.split(key, 2 + num_layers)
    emb_w, emb_b = dense(keys[0], input_dim, d_model)
    dec_w, dec_b = dense(keys[1], d_model, 1)

    layers = []
    for li in range(num_layers):
        lk = jax.random.split(keys[2 + li], 4)
        # Q/K/V projections stored pre-fused as a single (D, 3D) weight.
        wqkv, bqkv = dense(lk[0], d_model, 3 * d_model)
        wo, bo = dense(lk[1], d_model, d_model)
        w1, b1 = dense(lk[2], d_model, dim_ff)
        w2, b2 = dense(lk[3], dim_ff, d_model)
        layers.append(dict(
            wqkv=wqkv, bqkv=bqkv, wo=wo, bo=bo,
            w1=w1, b1=b1, w2=w2, b2=b2,
            ln1_g=jnp.ones((d_model,), jnp.float32),
            ln1_b=jnp.zeros((d_model,), jnp.float32),
            ln2_g=jnp.ones((d_model,), jnp.float32),
            ln2_b=jnp.zeros((d_model,), jnp.float32),
        ))
    return dict(emb_w=emb_w, emb_b=emb_b, dec_w=dec_w, dec_b=dec_b, layers=layers)


def encoder_layer(x, p, nhead):
    """Post-norm TransformerEncoderLayer (PyTorch default, eval mode)."""
    B, S, D = x.shape
    h1 = attention_block(x, p["wqkv"], p["bqkv"], p["wo"], p["bo"],
                         p["ln1_g"], p["ln1_b"], nhead=nhead)
    h2 = ffn_block(h1.reshape(B * S, D), p["w1"], p["b1"], p["w2"], p["b2"],
                   p["ln2_g"], p["ln2_b"])
    return h2.reshape(B, S, D)


def time_series_transformer(x, params, pe, *, nhead):
    B, S, _ = x.shape
    D = params["emb_w"].shape[1]
    h = embed_with_pe(x, params["emb_w"], params["emb_b"], pe)
    for lp in params["layers"]:
        h = encoder_layer(h, lp, nhead)
    out = decoder_linear(h.reshape(B * S, D), params["dec_w"], params["dec_b"])
    return out.reshape(B, S, 1)


# ---------------------------------- main -------------------------------------


if __name__ == "__main__":
    # Small shapes consistent with the module.
    batch, seq_len, input_dim = 2, 8, 4
    d_model, nhead, num_layers = 32, 4, 2
    dim_ff = 2048  # PyTorch nn.TransformerEncoderLayer default

    key = jax.random.PRNGKey(0)
    k_x, k_p = jax.random.split(key)
    x = jax.random.normal(k_x, (batch, seq_len, input_dim), jnp.float32)
    params = init_params(k_p, input_dim, d_model, nhead, num_layers, dim_ff)
    pe = sinusoidal_pe(seq_len, d_model)   # built once, outside the traced fn

    fwd = jax.jit(functools.partial(time_series_transformer, nhead=nhead))
    out = jax.block_until_ready(fwd(x, params, pe))
    assert out.shape == (batch, seq_len, 1)
    assert bool(jnp.all(jnp.isfinite(out)))
    print("KERNEL_OK")
</pallas_src>

<mosaic_0001>
module attributes {stable_mosaic.version = 11 : i64} {
  func.func @_attn_block_kernel(%arg0: i32, %arg1: memref<1x8x32xf32, #tpu.memory_space<vmem>>, %arg2: memref<32x96xf32, #tpu.memory_space<vmem>>, %arg3: memref<1x96xf32, #tpu.memory_space<vmem>>, %arg4: memref<32x32xf32, #tpu.memory_space<vmem>>, %arg5: memref<1x32xf32, #tpu.memory_space<vmem>>, %arg6: memref<1x32xf32, #tpu.memory_space<vmem>>, %arg7: memref<1x32xf32, #tpu.memory_space<vmem>>, %arg8: memref<1x8x32xf32, #tpu.memory_space<vmem>>) attributes {dimension_semantics = [#tpu.dimension_semantics<parallel>], iteration_bounds = array<i64: 2>, scalar_prefetch = 0 : i64, scratch_operands = 0 : i64, tpu.core_type = #tpu.core_type<tc>, window_params = [{transform_indices = @transform_0, window_bounds = array<i64: 1, 8, 32>}, {pipeline_mode = #tpu.pipeline_mode<synchronous>, transform_indices = @transform_1, window_bounds = array<i64: 32, 96>}, {pipeline_mode = #tpu.pipeline_mode<synchronous>, transform_indices = @transform_2, window_bounds = array<i64: 1, 96>}, {pipeline_mode = #tpu.pipeline_mode<synchronous>, transform_indices = @transform_3, window_bounds = array<i64: 32, 32>}, {pipeline_mode = #tpu.pipeline_mode<synchronous>, transform_indices = @transform_4, window_bounds = array<i64: 1, 32>}, {pipeline_mode = #tpu.pipeline_mode<synchronous>, transform_indices = @transform_5, window_bounds = array<i64: 1, 32>}, {pipeline_mode = #tpu.pipeline_mode<synchronous>, transform_indices = @transform_6, window_bounds = array<i64: 1, 32>}, {transform_indices = @transform_7, window_bounds = array<i64: 1, 8, 32>}]} {
    %c0 = arith.constant 0 : index
    %c0_0 = arith.constant 0 : index
    %c0_1 = arith.constant 0 : index
    %0 = vector.load %arg1[%c0, %c0_0, %c0_1] : memref<1x8x32xf32, #tpu.memory_space<vmem>>, vector<1x8x32xf32>
    %1 = vector.shape_cast %0 : vector<1x8x32xf32> to vector<8x32xf32>
    %c0_2 = arith.constant 0 : index
    %c0_3 = arith.constant 0 : index
    %2 = vector.load %arg2[%c0_2, %c0_3] : memref<32x96xf32, #tpu.memory_space<vmem>>, vector<32x96xf32>
    %cst = arith.constant dense<0.000000e+00> : vector<8x96xf32>
    %3 = tpu.matmul %1, %2, %cst {dimension_numbers = #tpu.dot_dimension_numbers<[1], [0], [0], [1], [0, 0, 1, 1], [], []>} : vector<8x32xf32>, vector<32x96xf32>, vector<8x96xf32> -> vector<8x96xf32>
    %c0_4 = arith.constant 0 : index
    %c0_5 = arith.constant 0 : index
    %4 = vector.load %arg3[%c0_4, %c0_5] : memref<1x96xf32, #tpu.memory_space<vmem>>, vector<1x96xf32>
    %5 = vector.broadcast %4 : vector<1x96xf32> to vector<8x96xf32>
    %6 = arith.addf %3, %5 : vector<8x96xf32>
    %7 = vector.extract_strided_slice %6 {offsets = [0, 0], sizes = [8, 32], strides = [1, 1]} : vector<8x96xf32> to vector<8x32xf32>
    %8 = vector.extract_strided_slice %6 {offsets = [0, 32], sizes = [8, 32], strides = [1, 1]} : vector<8x96xf32> to vector<8x32xf32>
    %9 = vector.extract_strided_slice %6 {offsets = [0, 64], sizes = [8, 32], strides = [1, 1]} : vector<8x96xf32> to vector<8x32xf32>
    %10 = vector.extract_strided_slice %7 {offsets = [0, 0], sizes = [8, 8], strides = [1, 1]} : vector<8x32xf32> to vector<8x8xf32>
    %11 = vector.extract_strided_slice %8 {offsets = [0, 0], sizes = [8, 8], strides = [1, 1]} : vector<8x32xf32> to vector<8x8xf32>
    %12 = vector.extract_strided_slice %9 {offsets = [0, 0], sizes = [8, 8], strides = [1, 1]} : vector<8x32xf32> to vector<8x8xf32>
    %cst_6 = arith.constant dense<0.000000e+00> : vector<8x8xf32>
    %13 = tpu.matmul %10, %11, %cst_6 {dimension_numbers = #tpu.dot_dimension_numbers<[1], [1], [0], [0], [0, 0, 1, 0], [], []>} : vector<8x8xf32>, vector<8x8xf32>, vector<8x8xf32> -> vector<8x8xf32>
    %cst_7 = arith.constant 0.353553385 : f32
    %14 = vector.broadcast %cst_7 : f32 to vector<8x8xf32>
    %15 = arith.mulf %13, %14 : vector<8x8xf32>
    %cst_8 = arith.constant dense<0xFF800000> : vector<8xf32>
    %16 = vector.multi_reduction <maximumf>, %15, %cst_8 [1] : vector<8x8xf32> to vector<8xf32>
    %17 = vector.shape_cast %16 : vector<8xf32> to vector<8x1xf32>
    %18 = vector.broadcast %17 : vector<8x1xf32> to vector<8x8xf32>
    %19 = arith.subf %15, %18 : vector<8x8xf32>
    %20 = math.exp %19 : vector<8x8xf32>
    %cst_9 = arith.constant dense<0.000000e+00> : vector<8xf32>
    %21 = vector.multi_reduction <add>, %20, %cst_9 [1] : vector<8x8xf32> to vector<8xf32>
    %22 = vector.shape_cast %21 : vector<8xf32> to vector<8x1xf32>
    %23 = tpu.reciprocal %22 {approx = true} : vector<8x1xf32> -> vector<8x1xf32>
    %24 = vector.broadcast %23 : vector<8x1xf32> to vector<8x8xf32>
    %25 = arith.mulf %20, %24 : vector<8x8xf32>
    %cst_10 = arith.constant dense<0.000000e+00> : vector<8x8xf32>
    %26 = tpu.matmul %25, %12, %cst_10 {dimension_numbers = #tpu.dot_dimension_numbers<[1], [0], [0], [1], [0, 0, 1, 1], [], []>} : vector<8x8xf32>, vector<8x8xf32>, vector<8x8xf32> -> vector<8x8xf32>
    %27 = vector.extract_strided_slice %7 {offsets = [0, 8], sizes = [8, 8], strides = [1, 1]} : vector<8x32xf32> to vector<8x8xf32>
    %28 = vector.extract_strided_slice %8 {offsets = [0, 8], sizes = [8, 8], strides = [1, 1]} : vector<8x32xf32> to vector<8x8xf32>
    %29 = vector.extract_strided_slice %9 {offsets = [0, 8], sizes = [8, 8], strides = [1, 1]} : vector<8x32xf32> to vector<8x8xf32>
    %cst_11 = arith.constant dense<0.000000e+00> : vector<8x8xf32>
    %30 = tpu.matmul %27, %28, %cst_11 {dimension_numbers = #tpu.dot_dimension_numbers<[1], [1], [0], [0], [0, 0, 1, 0], [], []>} : vector<8x8xf32>, vector<8x8xf32>, vector<8x8xf32> -> vector<8x8xf32>
    %cst_12 = arith.constant 0.353553385 : f32
    %31 = vector.broadcast %cst_12 : f32 to vector<8x8xf32>
    %32 = arith.mulf %30, %31 : vector<8x8xf32>
    %cst_13 = arith.constant dense<0xFF800000> : vector<8xf32>
    %33 = vector.multi_reduction <maximumf>, %32, %cst_13 [1] : vector<8x8xf32> to vector<8xf32>
    %34 = vector.shape_cast %33 : vector<8xf32> to vector<8x1xf32>
    %35 = vector.broadcast %34 : vector<8x1xf32> to vector<8x8xf32>
    %36 = arith.subf %32, %35 : vector<8x8xf32>
    %37 = math.exp %36 : vector<8x8xf32>
    %cst_14 = arith.constant dense<0.000000e+00> : vector<8xf32>
    %38 = vector.multi_reduction <add>, %37, %cst_14 [1] : vector<8x8xf32> to vector<8xf32>
    %39 = vector.shape_cast %38 : vector<8xf32> to vector<8x1xf32>
    %40 = tpu.reciprocal %39 {approx = true} : vector<8x1xf32> -> vector<8x1xf32>
    %41 = vector.broadcast %40 : vector<8x1xf32> to vector<8x8xf32>
    %42 = arith.mulf %37, %41 : vector<8x8xf32>
    %cst_15 = arith.constant dense<0.000000e+00> : vector<8x8xf32>
    %43 = tpu.matmul %42, %29, %cst_15 {dimension_numbers = #tpu.dot_dimension_numbers<[1], [0], [0], [1], [0, 0, 1, 1], [], []>} : vector<8x8xf32>, vector<8x8xf32>, vector<8x8xf32> -> vector<8x8xf32>
    %44 = vector.extract_strided_slice %7 {offsets = [0, 16], sizes = [8, 8], strides = [1, 1]} : vector<8x32xf32> to vector<8x8xf32>
    %45 = vector.extract_strided_slice %8 {offsets = [0, 16], sizes = [8, 8], strides = [1, 1]} : vector<8x32xf32> to vector<8x8xf32>
    %46 = vector.extract_strided_slice %9 {offsets = [0, 16], sizes = [8, 8], strides = [1, 1]} : vector<8x32xf32> to vector<8x8xf32>
    %cst_16 = arith.constant dense<0.000000e+00> : vector<8x8xf32>
    %47 = tpu.matmul %44, %45, %cst_16 {dimension_numbers = #tpu.dot_dimension_numbers<[1], [1], [0], [0], [0, 0, 1, 0], [], []>} : vector<8x8xf32>, vector<8x8xf32>, vector<8x8xf32> -> vector<8x8xf32>
    %cst_17 = arith.constant 0.353553385 : f32
    %48 = vector.broadcast %cst_17 : f32 to vector<8x8xf32>
    %49 = arith.mulf %47, %48 : vector<8x8xf32>
    %cst_18 = arith.constant dense<0xFF800000> : vector<8xf32>
    %50 = vector.multi_reduction <maximumf>, %49, %cst_18 [1] : vector<8x8xf32> to vector<8xf32>
    %51 = vector.shape_cast %50 : vector<8xf32> to vector<8x1xf32>
    %52 = vector.broadcast %51 : vector<8x1xf32> to vector<8x8xf32>
    %53 = arith.subf %49, %52 : vector<8x8xf32>
    %54 = math.exp %53 : vector<8x8xf32>
    %cst_19 = arith.constant dense<0.000000e+00> : vector<8xf32>
    %55 = vector.multi_reduction <add>, %54, %cst_19 [1] : vector<8x8xf32> to vector<8xf32>
    %56 = vector.shape_cast %55 : vector<8xf32> to vector<8x1xf32>
    %57 = tpu.reciprocal %56 {approx = true} : vector<8x1xf32> -> vector<8x1xf32>
    %58 = vector.broadcast %57 : vector<8x1xf32> to vector<8x8xf32>
    %59 = arith.mulf %54, %58 : vector<8x8xf32>
    %cst_20 = arith.constant dense<0.000000e+00> : vector<8x8xf32>
    %60 = tpu.matmul %59, %46, %cst_20 {dimension_numbers = #tpu.dot_dimension_numbers<[1], [0], [0], [1], [0, 0, 1, 1], [], []>} : vector<8x8xf32>, vector<8x8xf32>, vector<8x8xf32> -> vector<8x8xf32>
    %61 = vector.extract_strided_slice %7 {offsets = [0, 24], sizes = [8, 8], strides = [1, 1]} : vector<8x32xf32> to vector<8x8xf32>
    %62 = vector.extract_strided_slice %8 {offsets = [0, 24], sizes = [8, 8], strides = [1, 1]} : vector<8x32xf32> to vector<8x8xf32>
    %63 = vector.extract_strided_slice %9 {offsets = [0, 24], sizes = [8, 8], strides = [1, 1]} : vector<8x32xf32> to vector<8x8xf32>
    %cst_21 = arith.constant dense<0.000000e+00> : vector<8x8xf32>
    %64 = tpu.matmul %61, %62, %cst_21 {dimension_numbers = #tpu.dot_dimension_numbers<[1], [1], [0], [0], [0, 0, 1, 0], [], []>} : vector<8x8xf32>, vector<8x8xf32>, vector<8x8xf32> -> vector<8x8xf32>
    %cst_22 = arith.constant 0.353553385 : f32
    %65 = vector.broadcast %cst_22 : f32 to vector<8x8xf32>
    %66 = arith.mulf %64, %65 : vector<8x8xf32>
    %cst_23 = arith.constant dense<0xFF800000> : vector<8xf32>
    %67 = vector.multi_reduction <maximumf>, %66, %cst_23 [1] : vector<8x8xf32> to vector<8xf32>
    %68 = vector.shape_cast %67 : vector<8xf32> to vector<8x1xf32>
    %69 = vector.broadcast %68 : vector<8x1xf32> to vector<8x8xf32>
    %70 = arith.subf %66, %69 : vector<8x8xf32>
    %71 = math.exp %70 : vector<8x8xf32>
    %cst_24 = arith.constant dense<0.000000e+00> : vector<8xf32>
    %72 = vector.multi_reduction <add>, %71, %cst_24 [1] : vector<8x8xf32> to vector<8xf32>
    %73 = vector.shape_cast %72 : vector<8xf32> to vector<8x1xf32>
    %74 = tpu.reciprocal %73 {approx = true} : vector<8x1xf32> -> vector<8x1xf32>
    %75 = vector.broadcast %74 : vector<8x1xf32> to vector<8x8xf32>
    %76 = arith.mulf %71, %75 : vector<8x8xf32>
    %cst_25 = arith.constant dense<0.000000e+00> : vector<8x8xf32>
    %77 = tpu.matmul %76, %63, %cst_25 {dimension_numbers = #tpu.dot_dimension_numbers<[1], [0], [0], [1], [0, 0, 1, 1], [], []>} : vector<8x8xf32>, vector<8x8xf32>, vector<8x8xf32> -> vector<8x8xf32>
    %78 = tpu.concatenate %26, %43, %60, %77 in 1 : vector<8x8xf32>, vector<8x8xf32>, vector<8x8xf32>, vector<8x8xf32> -> vector<8x32xf32>
    %c0_26 = arith.constant 0 : index
    %c0_27 = arith.constant 0 : index
    %79 = vector.load %arg4[%c0_26, %c0_27] : memref<32x32xf32, #tpu.memory_space<vmem>>, vector<32x32xf32>
    %cst_28 = arith.constant dense<0.000000e+00> : vector<8x32xf32>
    %80 = tpu.matmul %78, %79, %cst_28 {dimension_numbers = #tpu.dot_dimension_numbers<[1], [0], [0], [1], [0, 0, 1, 1], [], []>} : vector<8x32xf32>, vector<32x32xf32>, vector<8x32xf32> -> vector<8x32xf32>
    %c0_29 = arith.constant 0 : index
    %c0_30 = arith.constant 0 : index
    %81 = vector.load %arg5[%c0_29, %c0_30] : memref<1x32xf32, #tpu.memory_space<vmem>>, vector<1x32xf32>
    %82 = vector.broadcast %81 : vector<1x32xf32> to vector<8x32xf32>
    %83 = arith.addf %80, %82 : vector<8x32xf32>
    %84 = arith.addf %1, %83 : vector<8x32xf32>
    %c0_31 = arith.constant 0 : index
    %c0_32 = arith.constant 0 : index
    %85 = vector.load %arg6[%c0_31, %c0_32] : memref<1x32xf32, #tpu.memory_space<vmem>>, vector<1x32xf32>
    %c0_33 = arith.constant 0 : index
    %c0_34 = arith.constant 0 : index
    %86 = vector.load %arg7[%c0_33, %c0_34] : memref<1x32xf32, #tpu.memory_space<vmem>>, vector<1x32xf32>
    %cst_35 = arith.constant dense<0.000000e+00> : vector<8xf32>
    %87 = vector.multi_reduction <add>, %84, %cst_35 [1] : vector<8x32xf32> to vector<8xf32>
    %88 = vector.shape_cast %87 : vector<8xf32> to vector<8x1xf32>
    %cst_36 = arith.constant 3.200000e+01 : f32
    %89 = vector.broadcast %cst_36 : f32 to vector<8x1xf32>
    %90 = arith.divf %88, %89 : vector<8x1xf32>
    %91 = vector.broadcast %90 : vector<8x1xf32> to vector<8x32xf32>
    %92 = arith.subf %84, %91 : vector<8x32xf32>
    %93 = arith.mulf %92, %92 : vector<8x32xf32>
    %cst_37 = arith.constant dense<0.000000e+00> : vector<8xf32>
    %94 = vector.multi_reduction <add>, %93, %cst_37 [1] : vector<8x32xf32> to vector<8xf32>
    %95 = vector.shape_cast %94 : vector<8xf32> to vector<8x1xf32>
    %cst_38 = arith.constant 3.200000e+01 : f32
    %96 = vector.broadcast %cst_38 : f32 to vector<8x1xf32>
    %97 = arith.divf %95, %96 : vector<8x1xf32>
    %98 = vector.broadcast %90 : vector<8x1xf32> to vector<8x32xf32>
    %99 = arith.subf %84, %98 : vector<8x32xf32>
    %cst_39 = arith.constant 9.99999974E-6 : f32
    %100 = vector.broadcast %cst_39 : f32 to vector<8x1xf32>
    %101 = arith.addf %97, %100 : vector<8x1xf32>
    %102 = math.rsqrt %101 : vector<8x1xf32>
    %103 = vector.broadcast %102 : vector<8x1xf32> to vector<8x32xf32>
    %104 = arith.mulf %99, %103 : vector<8x32xf32>
    %105 = vector.broadcast %85 : vector<1x32xf32> to vector<8x32xf32>
    %106 = arith.mulf %104, %105 : vector<8x32xf32>
    %107 = vector.broadcast %86 : vector<1x32xf32> to vector<8x32xf32>
    %108 = arith.addf %106, %107 : vector<8x32xf32>
    %c0_40 = arith.constant 0 : index
    %c0_41 = arith.constant 0 : index
    %c0_42 = arith.constant 0 : index
    %109 = vector.load %arg8[%c0_40, %c0_41, %c0_42] : memref<1x8x32xf32, #tpu.memory_space<vmem>>, vector<1x8x32xf32>
    %110 = vector.shape_cast %109 : vector<1x8x32xf32> to vector<8x32xf32>
    %111 = vector.shape_cast %108 : vector<8x32xf32> to vector<1x8x32xf32>
    tpu.vector_store %arg8[%c0_40, %c0_41, %c0_42], %111 {strides = array<i32>} : memref<1x8x32xf32, #tpu.memory_space<vmem>>, vector<1x8x32xf32>,
    return
  }
  func.func @transform_0(%arg0: i32) -> (i32, i32, i32) {
    %c0_i32 = arith.constant 0 : i32
    %c0_i32_0 = arith.constant 0 : i32
    %c0_i32_1 = arith.constant 0 : i32
    return %arg0, %c0_i32, %c0_i32_0 : i32, i32, i32
  }
  func.func @transform_1(%arg0: i32) -> (i32, i32) {
    %c0_i32 = arith.constant 0 : i32
    %c0_i32_0 = arith.constant 0 : i32
    %c0_i32_1 = arith.constant 0 : i32
    return %c0_i32, %c0_i32_0 : i32, i32
  }
  func.func @transform_2(%arg0: i32) -> (i32, i32) {
    %c0_i32 = arith.constant 0 : i32
    %c0_i32_0 = arith.constant 0 : i32
    %c0_i32_1 = arith.constant 0 : i32
    return %c0_i32, %c0_i32_0 : i32, i32
  }
  func.func @transform_3(%arg0: i32) -> (i32, i32) {
    %c0_i32 = arith.constant 0 : i32
    %c0_i32_0 = arith.constant 0 : i32
    %c0_i32_1 = arith.constant 0 : i32
    return %c0_i32, %c0_i32_0 : i32, i32
  }
  func.func @transform_4(%arg0: i32) -> (i32, i32) {
    %c0_i32 = arith.constant 0 : i32
    %c0_i32_0 = arith.constant 0 : i32
    %c0_i32_1 = arith.constant 0 : i32
    return %c0_i32, %c0_i32_0 : i32, i32
  }
  func.func @transform_5(%arg0: i32) -> (i32, i32) {
    %c0_i32 = arith.constant 0 : i32
    %c0_i32_0 = arith.constant 0 : i32
    %c0_i32_1 = arith.constant 0 : i32
    return %c0_i32, %c0_i32_0 : i32, i32
  }
  func.func @transform_6(%arg0: i32) -> (i32, i32) {
    %c0_i32 = arith.constant 0 : i32
    %c0_i32_0 = arith.constant 0 : i32
    %c0_i32_1 = arith.constant 0 : i32
    return %c0_i32, %c0_i32_0 : i32, i32
  }
  func.func @transform_7(%arg0: i32) -> (i32, i32, i32) {
    %c0_i32 = arith.constant 0 : i32
    %c0_i32_0 = arith.constant 0 : i32
    %c0_i32_1 = arith.constant 0 : i32
    return %arg0, %c0_i32, %c0_i32_0 : i32, i32, i32
  }
}

module attributes {stable_mosaic.version = 11 : i64} {
  func.func @_embed_pe_kernel(%arg0: i32, %arg1: memref<1x8x4xf32, #tpu.memory_space<vmem>>, %arg2: memref<4x32xf32, #tpu.memory_space<vmem>>, %arg3: memref<1x32xf32, #tpu.memory_space<vmem>>, %arg4: memref<1x8x32xf32, #tpu.memory_space<vmem>>, %arg5: memref<1x8x32xf32, #tpu.memory_space<vmem>>) attributes {dimension_semantics = [#tpu.dimension_semantics<parallel>], iteration_bounds = array<i64: 2>, scalar_prefetch = 0 : i64, scratch_operands = 0 : i64, tpu.core_type = #tpu.core_type<tc>, window_params = [{transform_indices = @transform_0, window_bounds = array<i64: 1, 8, 4>}, {pipeline_mode = #tpu.pipeline_mode<synchronous>, transform_indices = @transform_1, window_bounds = array<i64: 4, 32>}, {pipeline_mode = #tpu.pipeline_mode<synchronous>, transform_indices = @transform_2, window_bounds = array<i64: 1, 32>}, {pipeline_mode = #tpu.pipeline_mode<synchronous>, transform_indices = @transform_3, window_bounds = array<i64: 1, 8, 32>}, {transform_indices = @transform_4, window_bounds = array<i64: 1, 8, 32>}]} {
    %c0 = arith.constant 0 : index
    %c0_0 = arith.constant 0 : index
    %c0_1 = arith.constant 0 : index
    %0 = vector.load %arg1[%c0, %c0_0, %c0_1] : memref<1x8x4xf32, #tpu.memory_space<vmem>>, vector<1x8x4xf32>
    %1 = vector.shape_cast %0 : vector<1x8x4xf32> to vector<8x4xf32>
    %c0_2 = arith.constant 0 : index
    %c0_3 = arith.constant 0 : index
    %2 = vector.load %arg2[%c0_2, %c0_3] : memref<4x32xf32, #tpu.memory_space<vmem>>, vector<4x32xf32>
    %cst = arith.constant dense<0.000000e+00> : vector<8x32xf32>
    %3 = tpu.matmul %1, %2, %cst {dimension_numbers = #tpu.dot_dimension_numbers<[1], [0], [0], [1], [0, 0, 1, 1], [], []>} : vector<8x4xf32>, vector<4x32xf32>, vector<8x32xf32> -> vector<8x32xf32>
    %c0_4 = arith.constant 0 : index
    %c0_5 = arith.constant 0 : index
    %4 = vector.load %arg3[%c0_4, %c0_5] : memref<1x32xf32, #tpu.memory_space<vmem>>, vector<1x32xf32>
    %5 = vector.broadcast %4 : vector<1x32xf32> to vector<8x32xf32>
    %6 = arith.addf %3, %5 : vector<8x32xf32>
    %c0_6 = arith.constant 0 : index
    %c0_7 = arith.constant 0 : index
    %c0_8 = arith.constant 0 : index
    %7 = vector.load %arg4[%c0_6, %c0_7, %c0_8] : memref<1x8x32xf32, #tpu.memory_space<vmem>>, vector<1x8x32xf32>
    %8 = vector.shape_cast %7 : vector<1x8x32xf32> to vector<8x32xf32>
    %9 = arith.addf %6, %8 : vector<8x32xf32>
    %c0_9 = arith.constant 0 : index
    %c0_10 = arith.constant 0 : index
    %c0_11 = arith.constant 0 : index
    %10 = vector.load %arg5[%c0_9, %c0_10, %c0_11] : memref<1x8x32xf32, #tpu.memory_space<vmem>>, vector<1x8x32xf32>
    %11 = vector.shape_cast %10 : vector<1x8x32xf32> to vector<8x32xf32>
    %12 = vector.shape_cast %9 : vector<8x32xf32> to vector<1x8x32xf32>
    tpu.vector_store %arg5[%c0_9, %c0_10, %c0_11], %12 {strides = array<i32>} : memref<1x8x32xf32, #tpu.memory_space<vmem>>, vector<1x8x32xf32>,
    return
  }
  func.func @transform_0(%arg0: i32) -> (i32, i32, i32) {
    %c0_i32 = arith.constant 0 : i32
    %c0_i32_0 = arith.constant 0 : i32
    %c0_i32_1 = arith.constant 0 : i32
    return %arg0, %c0_i32, %c0_i32_0 : i32, i32, i32
  }
  func.func @transform_1(%arg0: i32) -> (i32, i32) {
    %c0_i32 = arith.constant 0 : i32
    %c0_i32_0 = arith.constant 0 : i32
    %c0_i32_1 = arith.constant 0 : i32
    return %c0_i32, %c0_i32_0 : i32, i32
  }
  func.func @transform_2(%arg0: i32) -> (i32, i32) {
    %c0_i32 = arith.constant 0 : i32
    %c0_i32_0 = arith.constant 0 : i32
    %c0_i32_1 = arith.constant 0 : i32
    return %c0_i32, %c0_i32_0 : i32, i32
  }
  func.func @transform_3(%arg0: i32) -> (i32, i32, i32) {
    %c0_i32 = arith.constant 0 : i32
    %c0_i32_0 = arith.constant 0 : i32
    %c0_i32_1 = arith.constant 0 : i32
    %c0_i32_2 = arith.constant 0 : i32
    return %c0_i32, %c0_i32_0, %c0_i32_1 : i32, i32, i32
  }
  func.func @transform_4(%arg0: i32) -> (i32, i32, i32) {
    %c0_i32 = arith.constant 0 : i32
    %c0_i32_0 = arith.constant 0 : i32
    %c0_i32_1 = arith.constant 0 : i32
    return %arg0, %c0_i32, %c0_i32_0 : i32, i32, i32
  }
}

module attributes {stable_mosaic.version = 11 : i64} {
  func.func @_ffn_block_kernel(%arg0: i32, %arg1: i32, %arg2: memref<16x32xf32, #tpu.memory_space<vmem>>, %arg3: memref<32x512xf32, #tpu.memory_space<vmem>>, %arg4: memref<1x512xf32, #tpu.memory_space<vmem>>, %arg5: memref<512x32xf32, #tpu.memory_space<vmem>>, %arg6: memref<1x32xf32, #tpu.memory_space<vmem>>, %arg7: memref<1x32xf32, #tpu.memory_space<vmem>>, %arg8: memref<1x32xf32, #tpu.memory_space<vmem>>, %arg9: memref<16x32xf32, #tpu.memory_space<vmem>>, %arg10: memref<16x32xf32, #tpu.memory_space<vmem>>) attributes {dimension_semantics = [#tpu.dimension_semantics<parallel>, #tpu.dimension_semantics<arbitrary>], iteration_bounds = array<i64: 1, 4>, scalar_prefetch = 0 : i64, scratch_operands = 1 : i64, tpu.core_type = #tpu.core_type<tc>, window_params = [{transform_indices = @transform_0, window_bounds = array<i64: 16, 32>}, {transform_indices = @transform_1, window_bounds = array<i64: 32, 512>}, {transform_indices = @transform_2, window_bounds = array<i64: 1, 512>}, {transform_indices = @transform_3, window_bounds = array<i64: 512, 32>}, {pipeline_mode = #tpu.pipeline_mode<synchronous>, transform_indices = @transform_4, window_bounds = array<i64: 1, 32>}, {pipeline_mode = #tpu.pipeline_mode<synchronous>, transform_indices = @transform_5, window_bounds = array<i64: 1, 32>}, {pipeline_mode = #tpu.pipeline_mode<synchronous>, transform_indices = @transform_6, window_bounds = array<i64: 1, 32>}, {transform_indices = @transform_7, window_bounds = array<i64: 16, 32>}]} {
    %c0_i32 = arith.constant 0 : i32
    %0 = arith.cmpi eq, %arg1, %c0_i32 : i32
    %1 = arith.extui %0 : i1 to i32
    %c0_i32_0 = arith.constant 0 : i32
    %2 = arith.cmpi ne, %1, %c0_i32_0 : i32
    scf.if %2 {
      %cst_15 = arith.constant 0.000000e+00 : f32
      %19 = vector.broadcast %cst_15 : f32 to vector<16x32xf32>
      %c0_16 = arith.constant 0 : index
      %c0_17 = arith.constant 0 : index
      %20 = vector.load %arg10[%c0_16, %c0_17] : memref<16x32xf32, #tpu.memory_space<vmem>>, vector<16x32xf32>
      tpu.vector_store %arg10[%c0_16, %c0_17], %19 {strides = array<i32>} : memref<16x32xf32, #tpu.memory_space<vmem>>, vector<16x32xf32>,
    } else {
    }
    %c0 = arith.constant 0 : index
    %c0_1 = arith.constant 0 : index
    %3 = vector.load %arg2[%c0, %c0_1] : memref<16x32xf32, #tpu.memory_space<vmem>>, vector<16x32xf32>
    %c0_2 = arith.constant 0 : index
    %c0_3 = arith.constant 0 : index
    %4 = vector.load %arg3[%c0_2, %c0_3] : memref<32x512xf32, #tpu.memory_space<vmem>>, vector<32x512xf32>
    %cst = arith.constant dense<0.000000e+00> : vector<16x512xf32>
    %5 = tpu.matmul %3, %4, %cst {dimension_numbers = #tpu.dot_dimension_numbers<[1], [0], [0], [1], [0, 0, 1, 1], [], []>} : vector<16x32xf32>, vector<32x512xf32>, vector<16x512xf32> -> vector<16x512xf32>
    %c0_4 = arith.constant 0 : index
    %c0_5 = arith.constant 0 : index
    %6 = vector.load %arg4[%c0_4, %c0_5] : memref<1x512xf32, #tpu.memory_space<vmem>>, vector<1x512xf32>
    %7 = vector.broadcast %6 : vector<1x512xf32> to vector<16x512xf32>
    %8 = arith.addf %5, %7 : vector<16x512xf32>
    %cst_6 = arith.constant 0.000000e+00 : f32
    %9 = vector.broadcast %cst_6 : f32 to vector<16x512xf32>
    %10 = arith.maximumf %8, %9 : vector<16x512xf32>
    %c0_7 = arith.constant 0 : index
    %c0_8 = arith.constant 0 : index
    %11 = vector.load %arg10[%c0_7, %c0_8] : memref<16x32xf32, #tpu.memory_space<vmem>>, vector<16x32xf32>
    %c0_9 = arith.constant 0 : index
    %c0_10 = arith.constant 0 : index
    %12 = vector.load %arg5[%c0_9, %c0_10] : memref<512x32xf32, #tpu.memory_space<vmem>>, vector<512x32xf32>
    %cst_11 = arith.constant dense<0.000000e+00> : vector<16x32xf32>
    %13 = tpu.matmul %10, %12, %cst_11 {dimension_numbers = #tpu.dot_dimension_numbers<[1], [0], [0], [1], [0, 0, 1, 1], [], []>} : vector<16x512xf32>, vector<512x32xf32>, vector<16x32xf32> -> vector<16x32xf32>
    %14 = arith.addf %11, %13 : vector<16x32xf32>
    %c0_12 = arith.constant 0 : index
    %c0_13 = arith.constant 0 : index
    %15 = vector.load %arg10[%c0_12, %c0_13] : memref<16x32xf32, #tpu.memory_space<vmem>>, vector<16x32xf32>
    tpu.vector_store %arg10[%c0_12, %c0_13], %14 {strides = array<i32>} : memref<16x32xf32, #tpu.memory_space<vmem>>, vector<16x32xf32>,
    %c3_i32 = arith.constant 3 : i32
    %16 = arith.cmpi eq, %arg1, %c3_i32 : i32
    %17 = arith.extui %16 : i1 to i32
    %c0_i32_14 = arith.constant 0 : i32
    %18 = arith.cmpi ne, %17, %c0_i32_14 : i32
    scf.if %18 {
      %c0_15 = arith.constant 0 : index
      %c0_16 = arith.constant 0 : index
      %19 = vector.load %arg10[%c0_15, %c0_16] : memref<16x32xf32, #tpu.memory_space<vmem>>, vector<16x32xf32>
      %c0_17 = arith.constant 0 : index
      %c0_18 = arith.constant 0 : index
      %20 = vector.load %arg6[%c0_17, %c0_18] : memref<1x32xf32, #tpu.memory_space<vmem>>, vector<1x32xf32>
      %21 = vector.broadcast %20 : vector<1x32xf32> to vector<16x32xf32>
      %22 = arith.addf %19, %21 : vector<16x32xf32>
      %23 = arith.addf %22, %3 : vector<16x32xf32>
      %c0_19 = arith.constant 0 : index
      %c0_20 = arith.constant 0 : index
      %24 = vector.load %arg7[%c0_19, %c0_20] : memref<1x32xf32, #tpu.memory_space<vmem>>, vector<1x32xf32>
      %c0_21 = arith.constant 0 : index
      %c0_22 = arith.constant 0 : index
      %25 = vector.load %arg8[%c0_21, %c0_22] : memref<1x32xf32, #tpu.memory_space<vmem>>, vector<1x32xf32>
      %cst_23 = arith.constant dense<0.000000e+00> : vector<16xf32>
      %26 = vector.multi_reduction <add>, %23, %cst_23 [1] : vector<16x32xf32> to vector<16xf32>
      %27 = vector.shape_cast %26 : vector<16xf32> to vector<16x1xf32>
      %cst_24 = arith.constant 3.200000e+01 : f32
      %28 = vector.broadcast %cst_24 : f32 to vector<16x1xf32>
      %29 = arith.divf %27, %28 : vector<16x1xf32>
      %30 = vector.broadcast %29 : vector<16x1xf32> to vector<16x32xf32>
      %31 = arith.subf %23, %30 : vector<16x32xf32>
      %32 = arith.mulf %31, %31 : vector<16x32xf32>
      %cst_25 = arith.constant dense<0.000000e+00> : vector<16xf32>
      %33 = vector.multi_reduction <add>, %32, %cst_25 [1] : vector<16x32xf32> to vector<16xf32>
      %34 = vector.shape_cast %33 : vector<16xf32> to vector<16x1xf32>
      %cst_26 = arith.constant 3.200000e+01 : f32
      %35 = vector.broadcast %cst_26 : f32 to vector<16x1xf32>
      %36 = arith.divf %34, %35 : vector<16x1xf32>
      %37 = vector.broadcast %29 : vector<16x1xf32> to vector<16x32xf32>
      %38 = arith.subf %23, %37 : vector<16x32xf32>
      %cst_27 = arith.constant 9.99999974E-6 : f32
      %39 = vector.broadcast %cst_27 : f32 to vector<16x1xf32>
      %40 = arith.addf %36, %39 : vector<16x1xf32>
      %41 = math.rsqrt %40 : vector<16x1xf32>
      %42 = vector.broadcast %41 : vector<16x1xf32> to vector<16x32xf32>
      %43 = arith.mulf %38, %42 : vector<16x32xf32>
      %44 = vector.broadcast %24 : vector<1x32xf32> to vector<16x32xf32>
      %45 = arith.mulf %43, %44 : vector<16x32xf32>
      %46 = vector.broadcast %25 : vector<1x32xf32> to vector<16x32xf32>
      %47 = arith.addf %45, %46 : vector<16x32xf32>
      %c0_28 = arith.constant 0 : index
      %c0_29 = arith.constant 0 : index
      %48 = vector.load %arg9[%c0_28, %c0_29] : memref<16x32xf32, #tpu.memory_space<vmem>>, vector<16x32xf32>
      tpu.vector_store %arg9[%c0_28, %c0_29], %47 {strides = array<i32>} : memref<16x32xf32, #tpu.memory_space<vmem>>, vector<16x32xf32>,
    } else {
    }
    return
  }
  func.func @transform_0(%arg0: i32, %arg1: i32) -> (i32, i32) {
    %c0_i32 = arith.constant 0 : i32
    %c0_i32_0 = arith.constant 0 : i32
    return %arg0, %c0_i32 : i32, i32
  }
  func.func @transform_1(%arg0: i32, %arg1: i32) -> (i32, i32) {
    %c0_i32 = arith.constant 0 : i32
    %c0_i32_0 = arith.constant 0 : i32
    return %c0_i32, %arg1 : i32, i32
  }
  func.func @transform_2(%arg0: i32, %arg1: i32) -> (i32, i32) {
    %c0_i32 = arith.constant 0 : i32
    %c0_i32_0 = arith.constant 0 : i32
    return %c0_i32, %arg1 : i32, i32
  }
  func.func @transform_3(%arg0: i32, %arg1: i32) -> (i32, i32) {
    %c0_i32 = arith.constant 0 : i32
    %c0_i32_0 = arith.constant 0 : i32
    return %arg1, %c0_i32 : i32, i32
  }
  func.func @transform_4(%arg0: i32, %arg1: i32) -> (i32, i32) {
    %c0_i32 = arith.constant 0 : i32
    %c0_i32_0 = arith.constant 0 : i32
    %c0_i32_1 = arith.constant 0 : i32
    return %c0_i32, %c0_i32_0 : i32, i32
  }
  func.func @transform_5(%arg0: i32, %arg1: i32) -> (i32, i32) {
    %c0_i32 = arith.constant 0 : i32
    %c0_i32_0 = arith.constant 0 : i32
    %c0_i32_1 = arith.constant 0 : i32
    return %c0_i32, %c0_i32_0 : i32, i32
  }
  func.func @transform_6(%arg0: i32, %arg1: i32) -> (i32, i32) {
    %c0_i32 = arith.constant 0 : i32
    %c0_i32_0 = arith.constant 0 : i32
    %c0_i32_1 = arith.constant 0 : i32
    return %c0_i32, %c0_i32_0 : i32, i32
  }
  func.func @transform_7(%arg0: i32, %arg1: i32) -> (i32, i32) {
    %c0_i32 = arith.constant 0 : i32
    %c0_i32_0 = arith.constant 0 : i32
    return %arg0, %c0_i32 : i32, i32
  }
}

module attributes {stable_mosaic.version = 11 : i64} {
  func.func @_decoder_kernel(%arg0: i32, %arg1: memref<16x32xf32, #tpu.memory_space<vmem>>, %arg2: memref<32x1xf32, #tpu.memory_space<vmem>>, %arg3: memref<1x1xf32, #tpu.memory_space<vmem>>, %arg4: memref<16x1xf32, #tpu.memory_space<vmem>>) attributes {dimension_semantics = [#tpu.dimension_semantics<parallel>], iteration_bounds = array<i64: 1>, scalar_prefetch = 0 : i64, scratch_operands = 0 : i64, tpu.core_type = #tpu.core_type<tc>, window_params = [{transform_indices = @transform_0, window_bounds = array<i64: 16, 32>}, {pipeline_mode = #tpu.pipeline_mode<synchronous>, transform_indices = @transform_1, window_bounds = array<i64: 32, 1>}, {pipeline_mode = #tpu.pipeline_mode<synchronous>, transform_indices = @transform_2, window_bounds = array<i64: 1, 1>}, {transform_indices = @transform_3, window_bounds = array<i64: 16, 1>}]} {
    %c0 = arith.constant 0 : index
    %c0_0 = arith.constant 0 : index
    %0 = vector.load %arg1[%c0, %c0_0] : memref<16x32xf32, #tpu.memory_space<vmem>>, vector<16x32xf32>
    %c0_1 = arith.constant 0 : index
    %c0_2 = arith.constant 0 : index
    %1 = vector.load %arg2[%c0_1, %c0_2] : memref<32x1xf32, #tpu.memory_space<vmem>>, vector<32x1xf32>
    %cst = arith.constant dense<0.000000e+00> : vector<16x1xf32>
    %2 = tpu.matmul %0, %1, %cst {dimension_numbers = #tpu.dot_dimension_numbers<[1], [0], [0], [1], [0, 0, 1, 1], [], []>} : vector<16x32xf32>, vector<32x1xf32>, vector<16x1xf32> -> vector<16x1xf32>
    %c0_3 = arith.constant 0 : index
    %c0_4 = arith.constant 0 : index
    %3 = vector.load %arg3[%c0_3, %c0_4] : memref<1x1xf32, #tpu.memory_space<vmem>>, vector<1x1xf32>
    %4 = vector.broadcast %3 : vector<1x1xf32> to vector<16x1xf32>
    %5 = arith.addf %2, %4 : vector<16x1xf32>
    %c0_5 = arith.constant 0 : index
    %c0_6 = arith.constant 0 : index
    %6 = vector.load %arg4[%c0_5, %c0_6] : memref<16x1xf32, #tpu.memory_space<vmem>>, vector<16x1xf32>
    tpu.vector_store %arg4[%c0_5, %c0_6], %5 {strides = array<i32>} : memref<16x1xf32, #tpu.memory_space<vmem>>, vector<16x1xf32>,
    return
  }
  func.func @transform_0(%arg0: i32) -> (i32, i32) {
    %c0_i32 = arith.constant 0 : i32
    %c0_i32_0 = arith.constant 0 : i32
    return %arg0, %c0_i32 : i32, i32
  }
  func.func @transform_1(%arg0: i32) -> (i32, i32) {
    %c0_i32 = arith.constant 0 : i32
    %c0_i32_0 = arith.constant 0 : i32
    %c0_i32_1 = arith.constant 0 : i32
    return %c0_i32, %c0_i32_0 : i32, i32
  }
  func.func @transform_2(%arg0: i32) -> (i32, i32) {
    %c0_i32 = arith.constant 0 : i32
    %c0_i32_0 = arith.constant 0 : i32
    %c0_i32_1 = arith.constant 0 : i32
    return %c0_i32, %c0_i32_0 : i32, i32
  }
  func.func @transform_3(%arg0: i32) -> (i32, i32) {
    %c0_i32 = arith.constant 0 : i32
    %c0_i32_0 = arith.constant 0 : i32
    return %arg0, %c0_i32 : i32, i32
  }
}

</mosaic_0001>

<bundles_post_ra>
// kernel: time_series_transformer.6
= control target key start
LH: loop header
LB: loop body
LE: loop exit
PB: predicated region body
PF: predicated region fallthrough
CT: control target
= control target key end

     0   :  { %s337_s15 = smov 0   ;;  %s357_s0 = inlined_call_operand.vmem [shape: f32[2,8,4], index: 0, kind: input, shape index: {}]   ;;  %s358_s1 = inlined_call_operand.vmem [shape: f32[4,32], index: 1, kind: input, shape index: {}]   ;;  %s359_s2 = inlined_call_operand.vmem [shape: f32[1,32], index: 2, kind: input, shape index: {}]   ;;  %s360_s3 = inlined_call_operand.vmem [shape: f32[1,8,32], index: 3, kind: input, shape index: {}]   ;;  %s361_s4 = inlined_call_operand.vmem [shape: f32[2,8,32], index: 4, kind: output, shape index: {}]  }
   0x1 LB: > { %s284_s16 = sadd.s32 4294967295, %s310_s15   ;;  %p288_p0 = scmp.ge.s32.totalorder %s310_s15, 1  ;;  %s310_s15 = sphi %s337_s15, %s14_s15  }
   0x2   : > { %p161_p1 = scmp.lt.s32.totalorder %s310_s15, 3 }
   0x4   : > { %p162_p2 = pnand %p288_p0, %p161_p1 }
   0x5   : > { %p185_p3 = scmp.lt.s32.totalorder (!%p162_p2), %s284_s16, 1 }
   0x6   : > { %165 = sbr.rel (%p162_p2) target bundleno = 146 (0x92), region = 36 }
   0xb   : > { %v194_v0 = vld [vmem:[%s358_s1] sm:$0xf]  ;;  %vm203_vm0 = vcmask 1043456   ;;  %s363_s16 = smov (!%p185_p3, %s284_s16), 1  ;;  %vm199_vm1 = vcmask 31744   ;;  %vm229_vm2 = vcmask 261120  }
   0xc   : > { %291 = vmatpush.msk.msra.mxu0 %vm203_vm0, %v194_v0  ;;  %s289_s19 = sshll.u32 %s363_s16, 3  ;;  %v303_v2 = vld [vmem:[%s359_s2] ss:$0 sm:$0xff] }
   0xd   : > { %s188_s22 = scalar_lea.vmem %s357_s0, %s289_s19  ;;  %v227_v4 = vld [vmem:[%s360_s3] sm:$0xff]  ;;  %s192_s29 = scalar_lea.vmem %s361_s4, %s289_s19 }
   0xe   : > { %v193_v1 = vld [vmem:[%s188_s22] sm:$0xff] }
   0xf   : > { %292 = vmatmul.msk.f32.vlgmr.msra.gmra.mxu0 %vm199_vm1, %v193_v1 }
  0x8c   : > { %v224_v3 = vpop.f32.mrf.mxu0 }
  0x8d   : > { %v225_v5 = vadd.f32 %v303_v2, %v224_v3 }
  0x8f   : > { %v228_v6 = vadd.f32 %v227_v4, %v225_v5 }
  0x91   : > { %230 = vst.msk [vmem:[%s192_s29] sm:$0xff] %vm229_vm2, %v228_v6 }
  0x92 PF: > { %s14_s15 = sadd.s32 1, %s310_s15  }
  0x93   : > { %p11_p4 = scmp.ge.s32.totalorder %s14_s15, 4  }
  0x95   :  { %13 = sbr.rel (!%p11_p4) target bundleno = 1 (0x1), region = 66 }

// kernel: time_series_transformer.7
= control target key start
LH: loop header
LB: loop body
LE: loop exit
PB: predicated region body
PF: predicated region fallthrough
CT: control target
= control target key end

     0   :  { %s846_s24 = smov 0   ;;  %s950_s0 = inlined_call_operand.vmem [shape: f32[2,8,32], index: 0, kind: input, shape index: {}]   ;;  %s951_s1 = inlined_call_operand.vmem [shape: f32[32,96], index: 1, kind: input, shape index: {}]   ;;  %s952_s2 = inlined_call_operand.vmem [shape: f32[1,96], index: 2, kind: input, shape index: {}]   ;;  %s953_s3 = inlined_call_operand.vmem [shape: f32[32,32], index: 3, kind: input, shape index: {}]   ;;  %s954_s4 = inlined_call_operand.vmem [shape: f32[1,32], index: 4, kind: input, shape index: {}]   ;;  %s955_s5 = inlined_call_operand.vmem [shape: f32[1,32], index: 5, kind: input, shape index: {}]   ;;  %s956_s6 = inlined_call_operand.vmem [shape: f32[1,32], index: 6, kind: input, shape index: {}]   ;;  %s957_s7 = inlined_call_operand.vmem [shape: f32[2,8,32], index: 7, kind: output, shape index: {}]  }
   0x1 LB: > { %s713_s25 = sadd.s32 4294967295, %s789_s24   ;;  %p717_p0 = scmp.ge.s32.totalorder %s789_s24, 1  ;;  %s789_s24 = sphi %s846_s24, %s17_s24  }
   0x2   : > { %p236_p1 = scmp.lt.s32.totalorder %s789_s24, 3 }
   0x4   : > { %p237_p2 = pnand %p717_p0, %p236_p1 }
   0x5   : > { %p266_p3 = scmp.lt.s32.totalorder (!%p237_p2), %s713_s25, 1  ;;  %s791_s17 = smov (!%p237_p2), 72  }
   0x6   : > { %240 = sbr.rel (%p237_p2) target bundleno = 1333 (0x535), region = 48  ;;  %s792_s18 = smov (!%p237_p2), 120  }
   0x7   : > { %s793_s19 = smov (!%p237_p2), 96   ;;  %s794_s20 = smov (!%p237_p2), 112  }
   0x8   : > { %s795_s21 = smov (!%p237_p2), 80   ;;  %s796_s22 = smov (!%p237_p2), 88  }
   0x9   : > { %s797_s23 = smov (!%p237_p2), 104   ;;  %s798_s26 = smov (!%p237_p2), 64  }
   0xa   : > { %s799_s27 = smov (!%p237_p2), 40   ;;  %s800_s28 = smov (!%p237_p2), 56  }
   0xb   : > { %v278_v0 = vld [vmem:[%s951_s1 + $0x18] sm:$0xff]  ;;  %v277_v1 = vld [vmem:[%s951_s1 + $0x10] sm:$0xff]  ;;  %v276_v2 = vld [vmem:[%s951_s1 + $0x8] sm:$0xff]  ;;  %s959_s25 = smov (!%p266_p3, %s713_s25), 1  ;;  %vm283_vm0 = vcmask 261120   ;;  %vm310_vm1 = vcmask 64512  }
   0xc   : > { %299 = vmatpush.msra.mxu0 %v278_v0  ;;  %v275_v3 = vld [vmem:[%s951_s1] sm:$0xff]  ;;  %s718_s11 = sshll.u32 %s959_s25, 3  ;;  %s801_s29 = smov 48   ;;  %vm584_vm2 = vcmask 130048   ;;  %vm586_vm3 = vcmask 195584  }
   0xd   : > { %s269_s14 = scalar_lea.vmem %s950_s0, %s718_s11  ;;  %v759_v5 = vld [vmem:[%s952_s2] ss:$0 sm:$0xff]  ;;  %s802_s30 = smov 16  }
   0xe   : > { %300 = vmatpush.msra.mxu0 %v277_v1  ;;  %v874_v4 = vld [vmem:[%s269_s14] sm:$0xff]  ;;  %s803_s8 = smov 8   ;;  %s804_s9 = smov 24  }
  0x10   : > { %301 = vmatpush.msra.mxu0 %v276_v2 }
  0x12   : > { %302 = vmatpush.msra.mxu0 %v275_v3  ;;  %v591_v3 = vld [vmem:[%s953_s3 + $0x18] sm:$0xff] }
  0x13   : > { %720 = vmatmul.msk.f32.vlgmr.msra.gmra.mxu0 %vm283_vm0, %v874_v4 }
  0x90   : > { %v304_v6 = vpop.f32.mrf.mxu0 }
  0x91   : > { %v881_v7 = vadd.f32 %v759_v5, %v304_v6  ;;  %v590_v5 = vld [vmem:[%s953_s3 + $0x10] sm:$0xff]  ;;  %v589_v6 = vld [vmem:[%s953_s3 + $0x8] sm:$0xff] }
  0x93   : > { %507 = vrot.lane.b32.xlu2 %v881_v7, %s791_s17  ;;  %373 = vrot.lane.b32.xlu1 %v881_v7, %s792_s18 }
  0x94   : > { %308 = vrot.lane.b32.xlu0 %v881_v7, %s793_s19 }
  0x9b   : > { %439 = vrot.lane.b32.xlu2 %v881_v7, %s794_s20  ;;  %441 = vrot.lane.b32.xlu1 %v881_v7, %s795_s21 }
  0x9c   : > { %375 = vrot.lane.b32.xlu0 %v881_v7, %s796_s22 }
  0xa4   : > { %505 = vrot.lane.b32.xlu0 %v881_v7, %s797_s23 }
  0xed   : > { %v508_v8 = vpop.permute.xlu2 %507 }
  0xee   : > { %730 = vmatpush.xpose.msk.msrb.mxu0 %vm310_vm1, %v508_v8 }
  0xf5   : > { %v440_v13 = vpop.permute.xlu2 %439 }
 0x105   : > { %v374_v9 = vpop.permute.xlu1 %373 }
 0x106   : > { %v309_v10 = vpop.permute.xlu0 %308 }
 0x107   : > { %721 = vmatpush.xpose.msk.msra.mxu1 %vm310_vm1, %v309_v10 }
 0x10a   : > { %722 = vmatmul.msk.f32.vlgmr.msra.gmra.mxu1 %vm310_vm1, %v881_v7 }
 0x10d   : > { %v442_v11 = vpop.permute.xlu1 %441 }
 0x10e   : > { %v376_v12 = vpop.permute.xlu0 %375  ;;  %727 = vmatpush.xpose.msk.msrb.mxu1 %vm310_vm1, %v442_v11 }
 0x10f   : > { %724 = vmatpush.xpose.msk.msra.mxu3 %vm310_vm1, %v376_v12 }
 0x112   : > { %725 = vmatmul.msk.f32.vlgmr.msra.gmra.mxu3 %vm310_vm1, %v374_v9  ;;  %728 = vmatmul.msk.f32.vlgmr.msrb.gmra.mxu1 %vm310_vm1, %v440_v13 }
 0x113   : > { %611 = vmatpush.msra.mxu1 %v591_v3 }
 0x115   : > { %612 = vmatpush.msra.mxu1 %v590_v5 }
 0x116   : > { %v506_v14 = vpop.permute.xlu0 %505 }
 0x117   : > { %731 = vmatmul.msk.f32.vlgmr.msrb.gmra.mxu0 %vm310_vm1, %v506_v14  ;;  %613 = vmatpush.msra.mxu1 %v589_v6  ;;  %v760_v14 = vld [vmem:[%s954_s4] ss:$0 sm:$0xff] }
 0x187   : > { %v332_v15 = vpop.f32.mrf.mxu1 }
 0x188   : > { %v335_v16 = vmul.f32 0.35355338, %v332_v15 }
 0x18a   : > { %v336_v17 = vsel %vm310_vm1, %v335_v16, -inf }
 0x18b   : > { %337 = vmax.xlane.f32.xlu1 %v336_v17 }
 0x18f   : > { %v464_v18 = vpop.f32.mrf.mxu1 }
 0x190   : > { %v467_v19 = vmul.f32 0.35355338, %v464_v18 }
 0x192   : > { %v468_v20 = vsel %vm310_vm1, %v467_v19, -inf }
 0x193   : > { %469 = vmax.xlane.f32.xlu0 %v468_v20 }
 0x194   : > { %v530_v24 = vpop.f32.mrf.mxu0 }
 0x195   : > { %v398_v21 = vpop.f32.mrf.mxu3  ;;  %v533_v25 = vmul.f32 0.35355338, %v530_v24 }
 0x196   : > { %v401_v22 = vmul.f32 0.35355338, %v398_v21 }
 0x197   : > { %v534_v26 = vsel %vm310_vm1, %v533_v25, -inf }
 0x198   : > { %v402_v23 = vsel %vm310_vm1, %v401_v22, -inf }
 0x199   : > { %403 = vmax.xlane.f32.xlu2 %v402_v23 }
 0x1a1   : > { %535 = vmax.xlane.f32.xlu2 %v534_v26 }
 0x1a7   : > { %347 = vrot.lane.b32.xlu0 %v881_v7, %s798_s26 }
 0x1af   : > { %545 = vrot.lane.b32.xlu0 %v881_v7, %s799_s27 }
 0x1fe   : > { %v338_v27 = vpop.xlane.xlu1 %337 }
 0x1ff   : > { %v339_v28 = vsub.f32 %v335_v16, %v338_v27 }
 0x201   : > { %v340_v29 = vmul.f32 1.442695, %v339_v28 }
 0x203   : > { %763 = vpow2.f32 %v340_v29 }
 0x206   : > { %v470_v30 = vpop.xlane.xlu0 %469 }
 0x207   : > { %v471_v31 = vsub.f32 %v467_v19, %v470_v30  ;;  %v805_v19 = vmov 32.0  }
 0x209   : > { %v764_v32 = vpop.eup %763  ;;  %v472_v33 = vmul.f32 1.442695, %v471_v31 }
 0x20a   : > { %v342_v34 = vsel %vm310_vm1, %v764_v32, 0.0 }
 0x20b   : > { %765 = vpow2.f32 %v472_v33  ;;  %343 = vadd.xlane.f32.xlu1 %v342_v34 }
 0x20c   : > { %v404_v35 = vpop.xlane.xlu2 %403 }
 0x20d   : > { %v405_v40 = vsub.f32 %v401_v22, %v404_v35 }
 0x20f   : > { %v406_v43 = vmul.f32 1.442695, %v405_v40 }
 0x211   : > { %v766_v36 = vpop.eup %765 }
 0x212   : > { %v474_v37 = vsel %vm310_vm1, %v766_v36, 0.0 }
 0x213   : > { %475 = vadd.xlane.f32.xlu1 %v474_v37 }
 0x214   : > { %v536_v38 = vpop.xlane.xlu2 %535 }
 0x215   : > { %v537_v39 = vsub.f32 %v533_v25, %v536_v38 }
 0x217   : > { %v538_v41 = vmul.f32 1.442695, %v537_v39  ;;  %v761_v39 = vld [vmem:[%s955_s5] ss:$0 sm:$0xff] }
 0x219   : > { %767 = vpow2.f32 %v538_v41  ;;  %v348_v42 = vpop.permute.xlu0 %347  ;;  %v762_v41 = vld [vmem:[%s956_s6] ss:$0 sm:$0xff] }
 0x21a   : > { %368 = vmatpush.msra.mxu2 %v348_v42  ;;  %769 = vpow2.f32 %v406_v43 }
 0x21f   : > { %v768_v44 = vpop.eup %767 }
 0x220   : > { %v540_v45 = vsel %vm310_vm1, %v768_v44, 0.0  ;;  %v770_v46 = vpop.eup %769 }
 0x221   : > { %541 = vadd.xlane.f32.xlu2 %v540_v45  ;;  %v408_v47 = vsel %vm310_vm1, %v770_v46, 0.0  ;;  %v546_v55 = vpop.permute.xlu0 %545 }
 0x229   : > { %409 = vadd.xlane.f32.xlu2 %v408_v47 }
 0x22c   : > { %413 = vrot.lane.b32.xlu1 %v881_v7, %s800_s28 }
 0x241   : > { %479 = vrot.lane.b32.xlu2 %v881_v7, %s801_s29  ;;  %v588_v7 = vld [vmem:[%s953_s3] sm:$0xff]  ;;  %s273_s29 = scalar_lea.vmem %s957_s7, %s718_s11 }
 0x242   : > { %614 = vmatpush.msra.mxu1 %v588_v7 }
 0x27e   : > { %v344_v48 = vpop.xlane.xlu1 %343 }
 0x27f   : > { %771 = vrcp.f32 %v344_v48 }
 0x285   : > { %v772_v49 = vpop.eup %771 }
 0x286   : > { %v346_v50 = vmul.f32 %v772_v49, %v764_v32  ;;  %v476_v52 = vpop.xlane.xlu1 %475 }
 0x287   : > { %773 = vrcp.f32 %v476_v52 }
 0x288   : > { %723 = vmatmul.msk.f32.vlgmr.msra.gmra.mxu2 %vm310_vm1, %v346_v50 }
 0x28d   : > { %v774_v56 = vpop.eup %773 }
 0x28e   : > { %v478_v60 = vmul.f32 %v774_v56, %v766_v36 }
 0x294   : > { %v542_v51 = vpop.xlane.xlu2 %541 }
 0x29c   : > { %v410_v53 = vpop.xlane.xlu2 %409 }
 0x29d   : > { %775 = vrcp.f32 %v410_v53 }
 0x29e   : > { %v414_v54 = vpop.permute.xlu1 %413  ;;  %777 = vrcp.f32 %v542_v51 }
 0x29f   : > { %434 = vmatpush.msrb.mxu2 %v414_v54  ;;  %779 = vrcp.f32 %v805_v19 }
 0x2a1   : > { %566 = vmatpush.msra.mxu2 %v546_v55 }
 0x2a3   : > { %v776_v57 = vpop.eup %775 }
 0x2a4   : > { %v480_v58 = vpop.permute.xlu2 %479  ;;  %v412_v59 = vmul.f32 %v776_v57, %v770_v46  ;;  %v778_v61 = vpop.eup %777 }
 0x2a5   : > { %500 = vmatpush.msrb.mxu3 %v480_v58  ;;  %v544_v62 = vmul.f32 %v778_v61, %v768_v44  ;;  %v780_v20 = vpop.eup %779 }
 0x2a6   : > { %726 = vmatmul.msk.f32.vlgmr.msrb.gmra.mxu2 %vm310_vm1, %v412_v59  ;;  %729 = vmatmul.msk.f32.vlgmr.msrb.gmra.mxu3 %vm310_vm1, %v478_v60  ;;  %v626_v21 = vmul.f32 32.0, %v780_v20  ;;  %vm630_vm4 = vweird.f32 %v780_v20 }
 0x2a8   : > { %v627_v22 = vsub.f32 1.0, %v626_v21 }
 0x2aa   : > { %v628_v23 = vmul.f32 %v780_v20, %v627_v22 }
 0x2ac   : > { %v629_v24 = vadd.f32 %v780_v20, %v628_v23 }
 0x2ae   : > { %732 = vmatmul.msk.f32.vlgmr.msra.gmra.mxu2 %vm310_vm1, %v544_v62  ;;  %v631_v25 = vsel %vm630_vm4, %v780_v20, %v629_v24 }
 0x30b   : > { %v370_v63 = vpop.f32.mrf.mxu2 }
 0x329   : > { %v436_v0 = vpop.f32.mrf.mxu2  ;;  %v502_v1 = vpop.f32.mrf.mxu3 }
 0x32a   : > { %576 = vrot.lane.b32.xlu1 %v502_v1, %s802_s30  ;;  %572 = vrot.lane.b32.xlu0 %v436_v0, %s803_s8 }
 0x331   : > { %v568_v2 = vpop.f32.mrf.mxu2 }
 0x332   : > { %580 = vrot.lane.b32.xlu0 %v568_v2, %s804_s9 }
 0x39c   : > { %v573_v8 = vpop.permute.xlu0 %572  ;;  %v577_v9 = vpop.permute.xlu1 %576 }
 0x39d   : > { %v583_v10 = vsel %vm310_vm1, %v370_v63, %v573_v8 }
 0x39e   : > { %v585_v11 = vsel %vm584_vm2, %v583_v10, %v577_v9 }
 0x3a4   : > { %v581_v12 = vpop.permute.xlu0 %580 }
 0x3a5   : > { %v587_v13 = vsel %vm586_vm3, %v585_v11, %v581_v12 }
 0x3a6   : > { %733 = vmatmul.msk.f32.vlgmr.msra.gmra.mxu1 %vm283_vm0, %v587_v13 }
 0x423   : > { %v616_v15 = vpop.f32.mrf.mxu1 }
 0x424   : > { %v617_v16 = vadd.f32 %v760_v14, %v616_v15 }
 0x426   : > { %v619_v17 = vadd.f32 %v617_v16, %v874_v4 }
 0x428   : > { %v622_v18 = vsel %vm283_vm0, %v619_v17, 0.0 }
 0x429   : > { %623 = vadd.xlane.f32.xlu2 %v622_v18 }
 0x49c   : > { %v624_v26 = vpop.xlane.xlu2 %623 }
 0x49d   : > { %v632_v27 = vmul.f32 %v631_v25, %v624_v26 }
 0x49f   : > { %v633_v28 = vsub.f32 %v619_v17, %v632_v27 }
 0x4a1   : > { %v634_v29 = vmul.f32 %v633_v28, %v633_v28 }
 0x4a3   : > { %v635_v30 = vsel %vm283_vm0, %v634_v29, 0.0 }
 0x4a4   : > { %636 = vadd.xlane.f32.xlu1 %v635_v30 }
 0x517   : > { %v637_v4 = vpop.xlane.xlu1 %636 }
 0x518   : > { %v638_v31 = vmul.f32 %v637_v4, %v631_v25 }
 0x51a   : > { %v639_v32 = vadd.f32 1e-05, %v638_v31 }
 0x51c   : > { %781 = vrsqrt.f32 %v639_v32  ;;  %vm646_vm6 = vweird.f32 %v639_v32 }
 0x522   : > { %v782_v33 = vpop.eup %781 }
 0x523   : > { %v641_v34 = vmul.f32 %v782_v33, %v639_v32  ;;  %vm647_vm5 = vweird.f32 %v782_v33 }
 0x524   : > { %vm648_vm7 = vmor %vm646_vm6, %vm647_vm5 }
 0x525   : > { %v642_v35 = vmul.f32 %v782_v33, %v641_v34 }
 0x527   : > { %v643_v36 = vmul.f32 0.5, %v642_v35 }
 0x529   : > { %v644_v37 = vsub.f32 1.5, %v643_v36 }
 0x52b   : > { %v645_v38 = vmul.f32 %v782_v33, %v644_v37 }
 0x52d   : > { %v649_v40 = vsel %vm648_vm7, %v782_v33, %v645_v38 }
 0x52e   : > { %v650_v42 = vmul.f32 %v649_v40, %v633_v28 }
 0x530   : > { %v654_v43 = vmul.f32 %v761_v39, %v650_v42 }
 0x532   : > { %v658_v44 = vadd.f32 %v762_v41, %v654_v43 }
 0x534   : > { %659 = vst.msk [vmem:[%s273_s29] sm:$0xff] %vm283_vm0, %v658_v44 }
 0x535 PF: > { %s17_s24 = sadd.s32 1, %s789_s24  }
 0x536   : > { %p14_p4 = scmp.ge.s32.totalorder %s17_s24, 4  }
 0x538   :  { %16 = sbr.rel (!%p14_p4) target bundleno = 1 (0x1), region = 78 }

// kernel: time_series_transformer.8
= control target key start
LH: loop header
LB: loop body
LE: loop exit
PB: predicated region body
PF: predicated region fallthrough
CT: control target
= control target key end

     0   :  { %s1053_s24 = smov 0   ;;  %s1055_s25 = smov 0   ;;  %s1285_s0 = inlined_call_operand.vmem [shape: f32[16,32], index: 0, kind: input, shape index: {}]   ;;  %s1286_s1 = inlined_call_operand.vmem [shape: f32[32,2048], index: 1, kind: input, shape index: {}]   ;;  %s1287_s2 = inlined_call_operand.vmem [shape: f32[1,2048], index: 2, kind: input, shape index: {}]   ;;  %s1288_s3 = inlined_call_operand.vmem [shape: f32[2048,32], index: 3, kind: input, shape index: {}]   ;;  %s1289_s4 = inlined_call_operand.vmem [shape: f32[1,32], index: 4, kind: input, shape index: {}]   ;;  %s1290_s5 = inlined_call_operand.vmem [shape: f32[1,32], index: 5, kind: input, shape index: {}]   ;;  %s1291_s6 = inlined_call_operand.vmem [shape: f32[1,32], index: 6, kind: input, shape index: {}]   ;;  %s1292_s7 = inlined_call_operand.vmem [shape: f32[16,32], index: 7, kind: output, shape index: {}]  }
   0x1   :  { %s1057_s26 = smov 0   ;;  %s1059_s27 = smov 0  }
   0x2   :  { %s1061_s28 = smov 0  }
   0x3 LB: > { %s26_s29 = sadd.s32 1, %s1005_s27  ;;  %p69_p1 = scmp.ne.s32.totalorder %s997_s25, %s993_s24  ;;  %s1009_s28 = sphi %s1061_s28, %s17_s28   ;;  %s1005_s27 = sphi %s1059_s27, %s1296_s27   ;;  %s1001_s26 = sphi %s1057_s26, %s1295_s26   ;;  %s997_s25 = sphi %s1055_s25, %s1294_s25   ;;  %s993_s24 = sphi %s1053_s24, %s1293_s24  }
   0x4   : > { %p27_p0 = scmp.ge.s32.totalorder %s26_s29, 4  ;;  %p70_p2 = scmp.eq.s32.totalorder %s1009_s28, 0 }
   0x5   : > { %s62_s8 = sadd.s32 1, %s997_s25  ;;  %p896_p5 = scmp.ge.s32.totalorder %s1009_s28, 4 }
   0x6   : > { %s1298_s29 = smov (%p27_p0, %s26_s29), 0  ;;  %p71_p3 = por %p70_p2, %p69_p1 }
   0x7   : > { %s59_s30 = ssub.s32 %s1005_s27, %s1298_s29  ;;  %254 = sbr.rel (%p896_p5) target bundleno = 32 (0x20), region = 32 }
   0x8   : > { %p60_p4 = scmp.eq.s32.totalorder %s59_s30, 0 }
   0xa   : > { %s1088_s9 = scalar_select %p60_p4, %s997_s25, %s62_s8  }
   0xc   : > { %257 = sbr.rel (!%p71_p3) target bundleno = 32 (0x20), region = 36  ;;  %s259_s10 = sand.u32 (%p71_p3), 1, %s997_s25  }
   0xd   : > { %s919_s11 = sshll.u32 (%p71_p3), %s1005_s27, 5  ;;  %s897_s12 = sshll.u32 (%p71_p3), %s259_s10, 7 }
   0xe   : > { %s1096_s15 = scalar_lea.vmem (%p71_p3), %s1286_s1, %s919_s11  ;;  %s261_s16 = scalar_lea.vmem (%p71_p3), [#allocation3], %s897_s12 }
   0xf   : > { %v277_v0 = vld [vmem:[%s1096_s15] sm:$0xff] (%p71_p3)  ;;  %v279_v1 = vld [vmem:[%s1096_s15 + $0x8] sm:$0xff] (%p71_p3)  ;;  %v281_v2 = vld [vmem:[%s1096_s15 + $0x10] sm:$0xff] (%p71_p3) }
  0x10   : > { %278 = vst [vmem:[%s261_s16] sm:$0xff] (%p71_p3), %v277_v0  ;;  %v283_v3 = vld [vmem:[%s1096_s15 + $0x18] sm:$0xff] (%p71_p3)  ;;  %v285_v4 = vld [vmem:[%s1096_s15 + $0x80] sm:$0xff] (%p71_p3)  ;;  %v287_v5 = vld [vmem:[%s1096_s15 + $0x88] sm:$0xff] (%p71_p3) }
  0x11   : > { %280 = vst [vmem:[%s261_s16 + $0x8] sm:$0xff] %v279_v1  ;;  %v289_v6 = vld [vmem:[%s1096_s15 + $0x90] sm:$0xff]  ;;  %v291_v7 = vld [vmem:[%s1096_s15 + $0x98] sm:$0xff]  ;;  %v293_v8 = vld [vmem:[%s1096_s15 + $0x100] sm:$0xff] }
  0x12   : > { %282 = vst [vmem:[%s261_s16 + $0x10] sm:$0xff] %v281_v2  ;;  %v295_v9 = vld [vmem:[%s1096_s15 + $0x108] sm:$0xff]  ;;  %v297_v10 = vld [vmem:[%s1096_s15 + $0x110] sm:$0xff]  ;;  %v299_v11 = vld [vmem:[%s1096_s15 + $0x118] sm:$0xff] }
  0x13   : > { %284 = vst [vmem:[%s261_s16 + $0x18] sm:$0xff] %v283_v3  ;;  %v301_v12 = vld [vmem:[%s1096_s15 + $0x180] sm:$0xff]  ;;  %v303_v13 = vld [vmem:[%s1096_s15 + $0x188] sm:$0xff]  ;;  %v305_v14 = vld [vmem:[%s1096_s15 + $0x190] sm:$0xff] }
  0x14   : > { %286 = vst [vmem:[%s261_s16 + $0x20] sm:$0xff] %v285_v4  ;;  %v307_v15 = vld [vmem:[%s1096_s15 + $0x198] sm:$0xff] }
  0x15   : > { %288 = vst [vmem:[%s261_s16 + $0x28] sm:$0xff] %v287_v5 }
  0x16   : > { %290 = vst [vmem:[%s261_s16 + $0x30] sm:$0xff] %v289_v6 }
  0x17   : > { %292 = vst [vmem:[%s261_s16 + $0x38] sm:$0xff] %v291_v7 }
  0x18   : > { %294 = vst [vmem:[%s261_s16 + $0x40] sm:$0xff] %v293_v8 }
  0x19   : > { %296 = vst [vmem:[%s261_s16 + $0x48] sm:$0xff] %v295_v9 }
  0x1a   : > { %298 = vst [vmem:[%s261_s16 + $0x50] sm:$0xff] %v297_v10 }
  0x1b   : > { %300 = vst [vmem:[%s261_s16 + $0x58] sm:$0xff] %v299_v11 }
  0x1c   : > { %302 = vst [vmem:[%s261_s16 + $0x60] sm:$0xff] %v301_v12 }
  0x1d   : > { %304 = vst [vmem:[%s261_s16 + $0x68] sm:$0xff] %v303_v13 }
  0x1e   : > { %306 = vst [vmem:[%s261_s16 + $0x70] sm:$0xff] %v305_v14 }
  0x1f   : > { %308 = vst [vmem:[%s261_s16 + $0x78] sm:$0xff] %v307_v15 }
  0x20 PF: > { %p900_p6 = scmp.ge.s32.totalorder %s1009_s28, 1  ;;  %p330_p7 = scmp.lt.s32.totalorder %s1009_s28, 5 }
  0x22   : > { %p331_p8 = pnand %p900_p6, %p330_p7 }
  0x23   : > { %s337_s17 = sand.u32 (!%p331_p8), 1, %s993_s24   ;;  %s902_s18 = sshll.u32 (!%p331_p8), %s1001_s26, 2 }
  0x24   : > { %334 = sbr.rel (%p331_p8) target bundleno = 625 (0x271), region = 67  ;;  %s901_s19 = sshll.u32 (!%p331_p8), %s337_s17, 7 }
  0x25   : > { %p390_p9 = scmp.lt.s32.totalorder (!%p331_p8), %s902_s18, 15  ;;  %s903_s20 = sshll.u32 (!%p331_p8), %s1001_s26, 6 }
  0x26   : > { %p395_p10 = scmp.lt.s32.totalorder (!%p331_p8), %s903_s20, 255  ;;  %s1130_s24 = scalar_lea.vmem (!%p331_p8), [#allocation3], %s901_s19 }
  0x27   : > { %p905_p11 = scmp.ne.s32.totalorder (!%p331_p8), %s1001_s26, 0 }
  0x29   : > { %s1300_s18 = smov (!%p390_p9, %s902_s18), 15  ;;  %s1302_s20 = smov (!%p395_p10, %s903_s20), 255 }
  0x2a   : > { %s392_s23 = scalar_lea.vmem %s1287_s2, %s1300_s18  ;;  %s904_s30 = sshll.u32 %s1302_s20, 3 }
  0x2b   : > { %s1128_s11 = scalar_lea.vmem %s1288_s3, %s904_s30  ;;  %409 = sbr.rel (%p905_p11) target bundleno = 51 (0x33), region = 75 }
  0x30   : > { %vm410_vm0 = vcmask 261120   ;;  %v1011_v16 = vmov 0.0  }
  0x31   : > { %411 = vst.msk [vmem:[#allocation2] sm:$0xff] %vm410_vm0, %v1011_v16 }
  0x32   : > { %412 = vst.msk [vmem:[#allocation2 + $0x8] sm:$0xff] %vm410_vm0, %v1011_v16 }
  0x33 PF: > { %v429_v17 = vld [vmem:[%s1130_s24 + $0x70] sm:$0xff]  ;;  %v430_v19 = vld [vmem:[%s1130_s24 + $0x78] sm:$0xff]  ;;  %v427_v23 = vld [vmem:[%s1130_s24 + $0x60] sm:$0xff]  ;;  %vm441_vm1 = vcmask 261120   ;;  %p914_p12 = scmp.ne.s32.totalorder %s1001_s26, 3 }
  0x34   : > { %v425_v18 = vld [vmem:[%s1130_s24 + $0x50] sm:$0xff]  ;;  %506 = vmatpush.msra.mxu2 %v429_v17  ;;  %529 = vmatpush.msra.mxu3 %v430_v19  ;;  %v426_v20 = vld [vmem:[%s1130_s24 + $0x58] sm:$0xff]  ;;  %v428_v24 = vld [vmem:[%s1130_s24 + $0x68] sm:$0xff] }
  0x35   : > { %v421_v21 = vld [vmem:[%s1130_s24 + $0x30] sm:$0xff]  ;;  %v422_v22 = vld [vmem:[%s1130_s24 + $0x38] sm:$0xff]  ;;  %v423_v25 = vld [vmem:[%s1130_s24 + $0x40] sm:$0xff]  ;;  %460 = vmatpush.msra.mxu0 %v427_v23  ;;  %483 = vmatpush.msra.mxu1 %v428_v24 }
  0x36   : > { %507 = vmatpush.msra.mxu2 %v425_v18  ;;  %530 = vmatpush.msra.mxu3 %v426_v20  ;;  %v417_v26 = vld [vmem:[%s1130_s24 + $0x10] sm:$0xff]  ;;  %v418_v27 = vld [vmem:[%s1130_s24 + $0x18] sm:$0xff]  ;;  %v424_v28 = vld [vmem:[%s1130_s24 + $0x48] sm:$0xff] }
  0x37   : > { %v1148_v29 = vld [vmem:[%s1285_s0] sm:$0xff]  ;;  %461 = vmatpush.msra.mxu0 %v423_v25  ;;  %484 = vmatpush.msra.mxu1 %v424_v28  ;;  %v419_v30 = vld [vmem:[%s1130_s24 + $0x20] sm:$0xff]  ;;  %v420_v31 = vld [vmem:[%s1130_s24 + $0x28] sm:$0xff] }
  0x38   : > { %508 = vmatpush.msra.mxu2 %v421_v21  ;;  %531 = vmatpush.msra.mxu3 %v422_v22  ;;  %v597_v32 = vld [vmem:[%s1128_s11 + $0x178] sm:$0xff]  ;;  %v415_v34 = vld [vmem:[%s1130_s24] sm:$0xff]  ;;  %v595_v40 = vld [vmem:[%s1128_s11 + $0x168] sm:$0xff] }
  0x39   : > { %v613_v33 = vld [vmem:[%s1128_s11 + $0x1f8] sm:$0xff]  ;;  %462 = vmatpush.msra.mxu0 %v419_v30  ;;  %485 = vmatpush.msra.mxu1 %v420_v31  ;;  %v596_v36 = vld [vmem:[%s1128_s11 + $0x170] sm:$0xff]  ;;  %v1173_v42 = vld [vmem:[%s1285_s0 + $0x8] sm:$0xff] }
  0x3a   : > { %509 = vmatpush.msra.mxu2 %v417_v26  ;;  %532 = vmatpush.msra.mxu3 %v418_v27  ;;  %v416_v35 = vld [vmem:[%s1130_s24 + $0x8] sm:$0xff]  ;;  %v612_v39 = vld [vmem:[%s1128_s11 + $0x1f0] sm:$0xff]  ;;  %v594_v44 = vld [vmem:[%s1128_s11 + $0x160] sm:$0xff] }
  0x3b   : > { %910 = vmatmul.msk.f32.vlgmr.msra.gmra.mxu2 %vm441_vm1, %v1148_v29  ;;  %912 = vmatmul.msk.f32.vlgmr.msra.gmra.mxu3 %vm441_vm1, %v1148_v29  ;;  %v565_v37 = vld [vmem:[%s1128_s11 + $0x78] sm:$0xff]  ;;  %v564_v41 = vld [vmem:[%s1128_s11 + $0x70] sm:$0xff]  ;;  %v611_v45 = vld [vmem:[%s1128_s11 + $0x1e8] sm:$0xff] }
  0x3c   : > { %660 = vmatpush.msrb.mxu2 %v597_v32  ;;  %683 = vmatpush.msrb.mxu3 %v613_v33  ;;  %v581_v38 = vld [vmem:[%s1128_s11 + $0xf8] sm:$0xff]  ;;  %v580_v43 = vld [vmem:[%s1128_s11 + $0xf0] sm:$0xff]  ;;  %v563_v46 = vld [vmem:[%s1128_s11 + $0x68] sm:$0xff] }
  0x3d   : > { %463 = vmatpush.msra.mxu0 %v415_v34  ;;  %486 = vmatpush.msra.mxu1 %v416_v35  ;;  %v579_v47 = vld [vmem:[%s1128_s11 + $0xe8] sm:$0xff]  ;;  %v593_v48 = vld [vmem:[%s1128_s11 + $0x158] sm:$0xff]  ;;  %v610_v49 = vld [vmem:[%s1128_s11 + $0x1e0] sm:$0xff] }
  0x3e   : > { %906 = vmatmul.msk.f32.vlgmr.msra.gmra.mxu0 %vm441_vm1, %v1148_v29  ;;  %908 = vmatmul.msk.f32.vlgmr.msra.gmra.mxu1 %vm441_vm1, %v1148_v29  ;;  %v562_v50 = vld [vmem:[%s1128_s11 + $0x60] sm:$0xff]  ;;  %v592_v52 = vld [vmem:[%s1128_s11 + $0x150] sm:$0xff]  ;;  %v609_v53 = vld [vmem:[%s1128_s11 + $0x1d8] sm:$0xff] }
  0x3f   : > { %661 = vmatpush.msrb.mxu2 %v596_v36  ;;  %614 = vmatpush.msrb.mxu0 %v565_v37  ;;  %v578_v51 = vld [vmem:[%s1128_s11 + $0xe0] sm:$0xff]  ;;  %v561_v54 = vld [vmem:[%s1128_s11 + $0x58] sm:$0xff]  ;;  %v591_v56 = vld [vmem:[%s1128_s11 + $0x148] sm:$0xff] }
  0x40   : > { %637 = vmatpush.msrb.mxu1 %v581_v38  ;;  %684 = vmatpush.msrb.mxu3 %v612_v39  ;;  %v577_v55 = vld [vmem:[%s1128_s11 + $0xd8] sm:$0xff]  ;;  %v608_v57 = vld [vmem:[%s1128_s11 + $0x1d0] sm:$0xff]  ;;  %v590_v60 = vld [vmem:[%s1128_s11 + $0x140] sm:$0xff] }
  0x41   : > { %662 = vmatpush.msrb.mxu2 %v595_v40  ;;  %615 = vmatpush.msrb.mxu0 %v564_v41  ;;  %v560_v58 = vld [vmem:[%s1128_s11 + $0x50] sm:$0xff]  ;;  %v607_v61 = vld [vmem:[%s1128_s11 + $0x1c8] sm:$0xff]  ;;  %v589_v0 = vld [vmem:[%s1128_s11 + $0x138] sm:$0xff] }
  0x42   : > { %638 = vmatpush.msrb.mxu1 %v580_v43  ;;  %685 = vmatpush.msrb.mxu3 %v611_v45  ;;  %v576_v59 = vld [vmem:[%s1128_s11 + $0xd0] sm:$0xff]  ;;  %v559_v62 = vld [vmem:[%s1128_s11 + $0x48] sm:$0xff]  ;;  %v606_v1 = vld [vmem:[%s1128_s11 + $0x1c0] sm:$0xff] }
  0x43   : > { %911 = vmatmul.msk.f32.gmra.mxu2 %vm441_vm1, %v1173_v42  ;;  %913 = vmatmul.msk.f32.gmra.mxu3 %vm441_vm1, %v1173_v42  ;;  %v575_v63 = vld [vmem:[%s1128_s11 + $0xc8] sm:$0xff]  ;;  %v558_v2 = vld [vmem:[%s1128_s11 + $0x40] sm:$0xff]  ;;  %v588_v4 = vld [vmem:[%s1128_s11 + $0x130] sm:$0xff] }
  0x44   : > { %663 = vmatpush.msrb.mxu2 %v594_v44  ;;  %616 = vmatpush.msrb.mxu0 %v563_v46  ;;  %v574_v3 = vld [vmem:[%s1128_s11 + $0xc0] sm:$0xff]  ;;  %v605_v5 = vld [vmem:[%s1128_s11 + $0x1b8] sm:$0xff]  ;;  %v587_v8 = vld [vmem:[%s1128_s11 + $0x128] sm:$0xff] }
  0x45   : > { %639 = vmatpush.msrb.mxu1 %v579_v47  ;;  %686 = vmatpush.msrb.mxu3 %v610_v49  ;;  %v557_v6 = vld [vmem:[%s1128_s11 + $0x38] sm:$0xff]  ;;  %v604_v9 = vld [vmem:[%s1128_s11 + $0x1b0] sm:$0xff]  ;;  %v586_v12 = vld [vmem:[%s1128_s11 + $0x120] sm:$0xff] }
  0x46   : > { %664 = vmatpush.msrb.mxu2 %v593_v48  ;;  %907 = vmatmul.msk.f32.gmra.mxu0 %vm441_vm1, %v1173_v42  ;;  %v573_v7 = vld [vmem:[%s1128_s11 + $0xb8] sm:$0xff]  ;;  %v556_v10 = vld [vmem:[%s1128_s11 + $0x30] sm:$0xff]  ;;  %v603_v13 = vld [vmem:[%s1128_s11 + $0x1a8] sm:$0xff] }
  0x47   : > { %909 = vmatmul.msk.f32.gmra.mxu1 %vm441_vm1, %v1173_v42  ;;  %617 = vmatpush.msrb.mxu0 %v562_v50  ;;  %v572_v11 = vld [vmem:[%s1128_s11 + $0xb0] sm:$0xff]  ;;  %v555_v14 = vld [vmem:[%s1128_s11 + $0x28] sm:$0xff]  ;;  %v585_v16 = vld [vmem:[%s1128_s11 + $0x118] sm:$0xff] }
  0x48   : > { %640 = vmatpush.msrb.mxu1 %v578_v51  ;;  %665 = vmatpush.msrb.mxu2 %v592_v52  ;;  %v571_v15 = vld [vmem:[%s1128_s11 + $0xa8] sm:$0xff]  ;;  %v602_v17 = vld [vmem:[%s1128_s11 + $0x1a0] sm:$0xff]  ;;  %v584_v20 = vld [vmem:[%s1128_s11 + $0x110] sm:$0xff] }
  0x49   : > { %687 = vmatpush.msrb.mxu3 %v609_v53  ;;  %618 = vmatpush.msrb.mxu0 %v561_v54  ;;  %v554_v18 = vld [vmem:[%s1128_s11 + $0x20] sm:$0xff]  ;;  %v601_v21 = vld [vmem:[%s1128_s11 + $0x198] sm:$0xff]  ;;  %v583_v24 = vld [vmem:[%s1128_s11 + $0x108] sm:$0xff] }
  0x4a   : > { %641 = vmatpush.msrb.mxu1 %v577_v55  ;;  %666 = vmatpush.msrb.mxu2 %v591_v56  ;;  %v570_v19 = vld [vmem:[%s1128_s11 + $0xa0] sm:$0xff]  ;;  %v553_v22 = vld [vmem:[%s1128_s11 + $0x18] sm:$0xff]  ;;  %v600_v25 = vld [vmem:[%s1128_s11 + $0x190] sm:$0xff] }
  0x4b   : > { %688 = vmatpush.msrb.mxu3 %v608_v57  ;;  %619 = vmatpush.msrb.mxu0 %v560_v58  ;;  %v569_v23 = vld [vmem:[%s1128_s11 + $0x98] sm:$0xff]  ;;  %v552_v26 = vld [vmem:[%s1128_s11 + $0x10] sm:$0xff]  ;;  %v582_v28 = vld [vmem:[%s1128_s11 + $0x100] sm:$0xff] }
  0x4c   : > { %642 = vmatpush.msrb.mxu1 %v576_v59  ;;  %667 = vmatpush.msrb.mxu2 %v590_v60  ;;  %v568_v27 = vld [vmem:[%s1128_s11 + $0x90] sm:$0xff]  ;;  %v599_v30 = vld [vmem:[%s1128_s11 + $0x188] sm:$0xff]  ;;  %v598_v33 = vld [vmem:[%s1128_s11 + $0x180] sm:$0xff] }
  0x4d   : > { %689 = vmatpush.msrb.mxu3 %v607_v61  ;;  %620 = vmatpush.msrb.mxu0 %v559_v62  ;;  %v551_v31 = vld [vmem:[%s1128_s11 + $0x8] sm:$0xff]  ;;  %v550_v34 = vld [vmem:[%s1128_s11] sm:$0xff] }
  0x4e   : > { %643 = vmatpush.msrb.mxu1 %v575_v63  ;;  %668 = vmatpush.msrb.mxu2 %v589_v0  ;;  %v567_v32 = vld [vmem:[%s1128_s11 + $0x88] sm:$0xff]  ;;  %v566_v35 = vld [vmem:[%s1128_s11 + $0x80] sm:$0xff] }
  0x4f   : > { %690 = vmatpush.msrb.mxu3 %v606_v1  ;;  %621 = vmatpush.msrb.mxu0 %v558_v2  ;;  %v431_v36 = vld [vmem:[%s392_s23] sm:$0xf] }
  0x50   : > { %644 = vmatpush.msrb.mxu1 %v574_v3  ;;  %669 = vmatpush.msrb.mxu2 %v588_v4  ;;  %v433_v37 = vperm.slane %v431_v36, 0  ;;  %v434_v38 = vperm.slane %v431_v36, 1  ;;  %v435_v39 = vperm.slane %v431_v36, 2  ;;  %v436_v40 = vperm.slane %v431_v36, 3 }
  0x51   : > { %691 = vmatpush.msrb.mxu3 %v605_v5  ;;  %622 = vmatpush.msrb.mxu0 %v557_v6 }
  0x52   : > { %645 = vmatpush.msrb.mxu1 %v573_v7  ;;  %670 = vmatpush.msrb.mxu2 %v587_v8  ;;  %v548_v8 = vld [vmem:[#allocation2] sm:$0xff] }
  0x53   : > { %692 = vmatpush.msrb.mxu3 %v604_v9  ;;  %623 = vmatpush.msrb.mxu0 %v556_v10 }
  0x54   : > { %646 = vmatpush.msrb.mxu1 %v572_v11  ;;  %671 = vmatpush.msrb.mxu2 %v586_v12 }
  0x55   : > { %693 = vmatpush.msrb.mxu3 %v603_v13  ;;  %624 = vmatpush.msrb.mxu0 %v555_v14 }
  0x56   : > { %647 = vmatpush.msrb.mxu1 %v571_v15  ;;  %672 = vmatpush.msrb.mxu2 %v585_v16 }
  0x57   : > { %694 = vmatpush.msrb.mxu3 %v602_v17  ;;  %625 = vmatpush.msrb.mxu0 %v554_v18  ;;  %v549_v17 = vld [vmem:[#allocation2 + $0x8] sm:$0xff] }
  0x58   : > { %648 = vmatpush.msrb.mxu1 %v570_v19  ;;  %673 = vmatpush.msrb.mxu2 %v584_v20 }
  0x59   : > { %695 = vmatpush.msrb.mxu3 %v601_v21  ;;  %626 = vmatpush.msrb.mxu0 %v553_v22 }
  0x5a   : > { %649 = vmatpush.msrb.mxu1 %v569_v23  ;;  %674 = vmatpush.msrb.mxu2 %v583_v24 }
  0x5b   : > { %696 = vmatpush.msrb.mxu3 %v600_v25  ;;  %627 = vmatpush.msrb.mxu0 %v552_v26 }
  0x5c   : > { %650 = vmatpush.msrb.mxu1 %v568_v27  ;;  %675 = vmatpush.msrb.mxu2 %v582_v28 }
  0x5d   : > { %697 = vmatpush.msrb.mxu3 %v599_v30  ;;  %628 = vmatpush.msrb.mxu0 %v551_v31 }
  0x5e   : > { %651 = vmatpush.msrb.mxu1 %v567_v32 }
  0x5f   : > { %698 = vmatpush.msrb.mxu3 %v598_v33  ;;  %629 = vmatpush.msrb.mxu0 %v550_v34 }
  0x60   : > { %652 = vmatpush.msrb.mxu1 %v566_v35 }
  0xbb   : > { %v465_v41 = vpop.f32.mrf.mxu0  ;;  %v488_v43 = vpop.f32.mrf.mxu1 }
  0xbc   : > { %v466_v44 = vadd.f32 %v465_v41, %v433_v37  ;;  %v489_v45 = vadd.f32 %v488_v43, %v434_v38 }
  0xbe   : > { %v511_v46 = vpop.f32.mrf.mxu2  ;;  %v534_v47 = vpop.f32.mrf.mxu3  ;;  %v540_v50 = vmax.f32 %v466_v44, 0.0  ;;  %v541_v51 = vmax.f32 %v489_v45, 0.0 }
  0xbf   : > { %v512_v48 = vadd.f32 %v511_v46, %v435_v39  ;;  %v535_v49 = vadd.f32 %v534_v47, %v436_v40 }
  0xc0   : > { %630 = vmatmul.f32.vlgmr.msrb.gmra.mxu0 %v540_v50  ;;  %653 = vmatmul.f32.vlgmr.msrb.gmra.mxu1 %v541_v51 }
  0xc1   : > { %v542_v52 = vmax.f32 %v512_v48, 0.0  ;;  %v543_v53 = vmax.f32 %v535_v49, 0.0 }
  0xc3   : > { %676 = vmatmul.f32.vlgmr.msrb.gmra.mxu2 %v542_v52  ;;  %699 = vmatmul.f32.vlgmr.msrb.gmra.mxu3 %v543_v53  ;;  %v468_v54 = vpop.f32.mrf.mxu0 }
  0xc4   : > { %v491_v55 = vpop.f32.mrf.mxu1  ;;  %v469_v56 = vadd.f32 %v468_v54, %v433_v37 }
  0xc5   : > { %v492_v57 = vadd.f32 %v491_v55, %v434_v38 }
  0xc6   : > { %v514_v58 = vpop.f32.mrf.mxu2  ;;  %v537_v59 = vpop.f32.mrf.mxu3  ;;  %v544_v62 = vmax.f32 %v469_v56, 0.0 }
  0xc7   : > { %v515_v60 = vadd.f32 %v514_v58, %v435_v39  ;;  %v538_v61 = vadd.f32 %v537_v59, %v436_v40  ;;  %v545_v63 = vmax.f32 %v492_v57, 0.0 }
  0xc8   : > { %633 = vmatmul.f32.gmra.mxu0 %v544_v62 }
  0xc9   : > { %v546_v0 = vmax.f32 %v515_v60, 0.0  ;;  %v547_v1 = vmax.f32 %v538_v61, 0.0  ;;  %656 = vmatmul.f32.gmra.mxu1 %v545_v63 }
  0xcb   : > { %679 = vmatmul.f32.gmra.mxu2 %v546_v0  ;;  %702 = vmatmul.f32.gmra.mxu3 %v547_v1 }
 0x13d   : > { %v631_v2 = vpop.f32.mrf.mxu0  ;;  %v654_v3 = vpop.f32.mrf.mxu1 }
 0x13e   : > { %v655_v4 = vadd.f32 %v654_v3, %v631_v2 }
 0x145   : > { %v634_v9 = vpop.f32.mrf.mxu0 }
 0x146   : > { %v677_v5 = vpop.f32.mrf.mxu2  ;;  %v700_v6 = vpop.f32.mrf.mxu3 }
 0x147   : > { %v678_v7 = vadd.f32 %v677_v5, %v655_v4  ;;  %v657_v10 = vpop.f32.mrf.mxu1 }
 0x148   : > { %v658_v13 = vadd.f32 %v657_v10, %v634_v9 }
 0x149   : > { %v701_v11 = vadd.f32 %v700_v6, %v678_v7 }
 0x14b   : > { %v706_v12 = vadd.f32 %v701_v11, %v548_v8 }
 0x14d   : > { %708 = vst.msk [vmem:[#allocation2] sm:$0xff] %vm441_vm1, %v706_v12 }
 0x14e   : > { %v680_v14 = vpop.f32.mrf.mxu2  ;;  %v703_v15 = vpop.f32.mrf.mxu3 }
 0x14f   : > { %v681_v16 = vadd.f32 %v680_v14, %v658_v13 }
 0x151   : > { %v704_v18 = vadd.f32 %v703_v15, %v681_v16  ;;  %713 = sbr.rel (%p914_p12) target bundleno = 625 (0x271), region = 79 }
 0x153   : > { %v707_v19 = vadd.f32 %v704_v18, %v549_v17 }
 0x155   : > { %709 = vst.msk [vmem:[#allocation2 + $0x8] sm:$0xff] %vm441_vm1, %v707_v19 }
 0x156   : > { %v714_v20 = vld [vmem:[#allocation2] sm:$0xff]  ;;  %v1012_v30 = vmov 32.0  }
 0x157   : > { %v962_v21 = vld [vmem:[%s1289_s4] ss:$0 sm:$0xff]  ;;  %965 = vrcp.f32 %v1012_v30 }
 0x158   : > { %v720_v23 = vadd.f32 %v962_v21, %v714_v20  ;;  %v963_v60 = vld [vmem:[%s1290_s5] ss:$0 sm:$0xff] }
 0x159   : > { %v964_v63 = vld [vmem:[%s1291_s6] ss:$0 sm:$0xff] }
 0x15a   : > { %v722_v24 = vadd.f32 %v720_v23, %v1148_v29 }
 0x15c   : > { %v715_v22 = vld [vmem:[#allocation2 + $0x8] sm:$0xff]  ;;  %v726_v26 = vsel %vm441_vm1, %v722_v24, 0.0 }
 0x15d   : > { %v721_v25 = vadd.f32 %v962_v21, %v715_v22  ;;  %727 = vadd.xlane.f32.xlu0 %v726_v26  ;;  %v966_v31 = vpop.eup %965 }
 0x15e   : > { %v733_v32 = vmul.f32 32.0, %v966_v31  ;;  %vm737_vm2 = vweird.f32 %v966_v31 }
 0x15f   : > { %v723_v27 = vadd.f32 %v721_v25, %v1173_v42 }
 0x160   : > { %v734_v33 = vsub.f32 1.0, %v733_v32 }
 0x161   : > { %v729_v28 = vsel %vm441_vm1, %v723_v27, 0.0 }
 0x162   : > { %v735_v34 = vmul.f32 %v966_v31, %v734_v33 }
 0x164   : > { %v736_v35 = vadd.f32 %v966_v31, %v735_v34 }
 0x165   : > { %730 = vadd.xlane.f32.xlu0 %v729_v28 }
 0x166   : > { %v738_v36 = vsel %vm737_vm2, %v966_v31, %v736_v35 }
 0x1d0   : > { %v728_v37 = vpop.xlane.xlu0 %727 }
 0x1d1   : > { %v739_v29 = vmul.f32 %v738_v36, %v728_v37 }
 0x1d3   : > { %v741_v38 = vsub.f32 %v722_v24, %v739_v29 }
 0x1d5   : > { %v743_v39 = vmul.f32 %v741_v38, %v741_v38 }
 0x1d7   : > { %v745_v40 = vsel %vm441_vm1, %v743_v39, 0.0 }
 0x1d8   : > { %746 = vadd.xlane.f32.xlu1 %v745_v40  ;;  %v731_v42 = vpop.xlane.xlu0 %730 }
 0x1d9   : > { %v740_v41 = vmul.f32 %v738_v36, %v731_v42 }
 0x1db   : > { %v742_v43 = vsub.f32 %v723_v27, %v740_v41 }
 0x1dd   : > { %v744_v44 = vmul.f32 %v742_v43, %v742_v43 }
 0x1df   : > { %v748_v45 = vsel %vm441_vm1, %v744_v44, 0.0 }
 0x1e0   : > { %749 = vadd.xlane.f32.xlu1 %v748_v45 }
 0x24b   : > { %v747_v46 = vpop.xlane.xlu1 %746 }
 0x24c   : > { %v751_v47 = vmul.f32 %v747_v46, %v738_v36 }
 0x24e   : > { %v753_v48 = vadd.f32 1e-05, %v751_v47 }
 0x250   : > { %967 = vrsqrt.f32 %v753_v48  ;;  %vm761_vm4 = vweird.f32 %v753_v48 }
 0x253   : > { %v750_v49 = vpop.xlane.xlu1 %749 }
 0x254   : > { %v752_v50 = vmul.f32 %v750_v49, %v738_v36 }
 0x256   : > { %v968_v51 = vpop.eup %967  ;;  %v754_v52 = vadd.f32 1e-05, %v752_v50 }
 0x257   : > { %v756_v53 = vmul.f32 %v968_v51, %v753_v48  ;;  %vm762_vm3 = vweird.f32 %v968_v51 }
 0x258   : > { %969 = vrsqrt.f32 %v754_v52  ;;  %vm763_vm5 = vmor %vm761_vm4, %vm762_vm3  ;;  %vm771_vm7 = vweird.f32 %v754_v52 }
 0x259   : > { %v757_v54 = vmul.f32 %v968_v51, %v756_v53 }
 0x25b   : > { %v758_v55 = vmul.f32 0.5, %v757_v54 }
 0x25d   : > { %v759_v56 = vsub.f32 1.5, %v758_v55 }
 0x25e   : > { %v970_v57 = vpop.eup %969 }
 0x25f   : > { %v760_v58 = vmul.f32 %v968_v51, %v759_v56  ;;  %v766_v59 = vmul.f32 %v970_v57, %v754_v52  ;;  %vm772_vm6 = vweird.f32 %v970_v57 }
 0x260   : > { %vm773_vm8 = vmor %vm771_vm7, %vm772_vm6 }
 0x261   : > { %v764_v61 = vsel %vm763_vm5, %v968_v51, %v760_v58  ;;  %v767_v62 = vmul.f32 %v970_v57, %v766_v59 }
 0x262   : > { %v775_v0 = vmul.f32 %v764_v61, %v741_v38 }
 0x263   : > { %v768_v1 = vmul.f32 0.5, %v767_v62 }
 0x264   : > { %v780_v2 = vmul.f32 %v963_v60, %v775_v0 }
 0x265   : > { %v769_v3 = vsub.f32 1.5, %v768_v1 }
 0x266   : > { %v785_v4 = vadd.f32 %v964_v63, %v780_v2 }
 0x267   : > { %v770_v5 = vmul.f32 %v970_v57, %v769_v3 }
 0x268   : > { %787 = vst.msk [vmem:[%s1292_s7] sm:$0xff] %vm441_vm1, %v785_v4 }
 0x269   : > { %v774_v6 = vsel %vm773_vm8, %v970_v57, %v770_v5 }
 0x26a   : > { %v776_v7 = vmul.f32 %v774_v6, %v742_v43 }
 0x26c   : > { %v781_v8 = vmul.f32 %v963_v60, %v776_v7 }
 0x26e   : > { %v786_v9 = vadd.f32 %v964_v63, %v781_v8 }
 0x270   : > { %788 = vst.msk [vmem:[%s1292_s7 + $0x8] sm:$0xff] %vm441_vm1, %v786_v9 }
 0x271 PF: > { %s17_s28 = sadd.s32 1, %s1009_s28   ;;  %s1293_s24 = smov %s997_s25 }
 0x272   : > { %p14_p13 = scmp.ge.s32.totalorder %s17_s28, 6   ;;  %s1294_s25 = smov %s1088_s9 }
 0x273   : > { %s1295_s26 = smov %s1005_s27  ;;  %s1296_s27 = smov %s1298_s29 }
 0x274   :  { %16 = sbr.rel (!%p14_p13) target bundleno = 3 (0x3), region = 123 }

// kernel: time_series_transformer.11
= control target key start
LH: loop header
LB: loop body
LE: loop exit
PB: predicated region body
PF: predicated region fallthrough
CT: control target
= control target key end

     0   :  { %vm26_vm0 = vcmask 261120   ;;  %vm56_vm1 = vcmask 7168   ;;  %s117_s1 = inlined_call_operand.vmem [shape: f32[32,1], index: 1, kind: input, shape index: {}]   ;;  %s118_s2 = inlined_call_operand.<no memory space> [shape: f32[1,1], index: 2, kind: input, shape index: {}]   ;;  %s119_s0 = inlined_call_operand.vmem [shape: f32[16,32], index: 0, kind: input, shape index: {}]   ;;  %s120_s3 = inlined_call_operand.vmem [shape: f32[16,1], index: 3, kind: output, shape index: {}]  }
   0x1   :  { %v21_v0 = vld [vmem:[%s117_s1 + $0x18] sm:$0xff]  ;;  %v20_v1 = vld [vmem:[%s117_s1 + $0x10] sm:$0xff]  ;;  %v8_v2 = vstv %s118_s2  ;;  %v19_v3 = vld [vmem:[%s117_s1 + $0x8] sm:$0xff] }
   0x2   :  { %45 = vmatpush.msra.mxu0 %v21_v0  ;;  %65 = vmatpush.msra.mxu1 %v21_v0  ;;  %9 = vst [vmem:[#allocation2] sm:$0x1] %v8_v2  ;;  %v18_v4 = vld [vmem:[%s117_s1] sm:$0xff]  ;;  %v17_v6 = vld [vmem:[%s119_s0 + $0x8] sm:$0xff] }
   0x3   :  { %v16_v5 = vld [vmem:[%s119_s0] sm:$0xff] }
   0x4   :  { %46 = vmatpush.msra.mxu0 %v20_v1  ;;  %66 = vmatpush.msra.mxu1 %v20_v1 }
   0x6   :  { %47 = vmatpush.msra.mxu0 %v19_v3  ;;  %67 = vmatpush.msra.mxu1 %v19_v3 }
   0x8   :  { %48 = vmatpush.msra.mxu0 %v18_v4  ;;  %68 = vmatpush.msra.mxu1 %v18_v4 }
   0x9   :  { %63 = vmatmul.msk.f32.vlgmr.msra.gmra.mxu0 %vm26_vm0, %v16_v5  ;;  %64 = vmatmul.msk.f32.vlgmr.msra.gmra.mxu1 %vm26_vm0, %v17_v6  ;;  %v69_v7 = vld [vmem:[#allocation2] ss:$0 sm:$0xff] }
  0x86   :  { %v50_v8 = vpop.f32.mrf.mxu0  ;;  %v53_v9 = vpop.f32.mrf.mxu1 }
  0x87   :  { %v51_v10 = vadd.f32 %v69_v7, %v50_v8  ;;  %v54_v11 = vadd.f32 %v69_v7, %v53_v9 }
  0x89   :  { %57 = vst.msk [vmem:[%s120_s3] sm:$0xff] %vm56_vm1, %v51_v10 }
  0x8a   :  { %58 = vst.msk [vmem:[%s120_s3 + $0x8] sm:$0xff] %vm56_vm1, %v54_v11 }

</bundles_post_ra>
